<compile_context>
chip_gen: v5e
topology: v5e:2x2
jax: 0.10.0
libtpu: 0.0.40
codegen_flags: <defaults>
</compile_context>

<pallas_src>
import functools

import jax
import jax.numpy as jnp
from jax.experimental import pallas as pl
from jax.experimental.pallas import tpu as pltpu

LANE = 128
VMEM_LIMIT = 32 * 1024 * 1024


def _compiler_params(semantics):
    return pltpu.CompilerParams(
        dimension_semantics=semantics, vmem_limit_bytes=VMEM_LIMIT
    )


# ----------------------------------------------------------------------------
# Fused 3x3 stride-1 conv kernels (no materialized im2col):
#   the kernel receives the spatially zero-padded NHWC activation for one batch
#   element and one 128-wide Cout tile, and accumulates the 9 (di, dj) taps
#   with in-kernel matmuls into a VMEM f32 accumulator.
# ----------------------------------------------------------------------------
def _conv3x3_accumulate(xp_ref, w_ref, acc_ref):
    hp, wp, cin = xp_ref.shape
    h, w = hp - 2, wp - 2
    first = True
    for di in range(3):
        for dj in range(3):
            tap = xp_ref[di:di + h, dj:dj + w, :].reshape(h * w, cin)
            contrib = jnp.dot(tap, w_ref[di, dj],
                              preferred_element_type=jnp.float32)
            if first:
                acc_ref[...] = contrib
                first = False
            else:
                acc_ref[...] += contrib


def _conv3x3_kernel(xp_ref, w_ref, s_ref, b_ref, o_ref, acc_ref, *, relu):
    _conv3x3_accumulate(xp_ref, w_ref, acc_ref)
    acc = acc_ref[...] * s_ref[...] + b_ref[...]
    if relu:
        acc = jnp.maximum(acc, 0.0)
    o_ref[...] = acc.astype(o_ref.dtype)


def _conv3x3_res_kernel(xp_ref, w_ref, s_ref, b_ref, r_ref, o_ref, acc_ref, *, relu):
    _conv3x3_accumulate(xp_ref, w_ref, acc_ref)
    acc = acc_ref[...] * s_ref[...] + b_ref[...] + r_ref[...].astype(jnp.float32)
    if relu:
        acc = jnp.maximum(acc, 0.0)
    o_ref[...] = acc.astype(o_ref.dtype)


def _conv3x3_proj_kernel(xp_ref, w_ref, s_ref, b_ref, sx_ref, sw_ref, o_ref,
                         acc_ref, *, relu):
    _conv3x3_accumulate(xp_ref, w_ref, acc_ref)
    skip = jnp.dot(sx_ref[...], sw_ref[...], preferred_element_type=jnp.float32)
    acc = acc_ref[...] * s_ref[...] + b_ref[...] + skip
    if relu:
        acc = jnp.maximum(acc, 0.0)
    o_ref[...] = acc.astype(o_ref.dtype)


def _conv3x3_s1_fused(x, w4, scale, bias, *, relu, residual, skip):
    n, h, w, cin = x.shape
    cout = w4.shape[-1]
    tco = LANE
    m = h * w
    xp = jnp.pad(x, ((0, 0), (1, 1), (1, 1), (0, 0)))
    hp, wp = h + 2, w + 2
    scale2 = scale.reshape(1, cout)
    bias2 = bias.reshape(1, cout)

    in_specs = [
        pl.BlockSpec((None, hp, wp, cin), lambda i, j: (i, 0, 0, 0)),
        pl.BlockSpec((3, 3, cin, tco), lambda i, j: (0, 0, 0, j)),
        pl.BlockSpec((1, tco), lambda i, j: (0, j)),
        pl.BlockSpec((1, tco), lambda i, j: (0, j)),
    ]
    args = [xp, w4, scale2, bias2]
    if residual is not None:
        in_specs.append(pl.BlockSpec((None, m, tco), lambda i, j: (i, 0, j)))
        args.append(residual.reshape(n, m, cout))
        kernel = functools.partial(_conv3x3_res_kernel, relu=relu)
    elif skip is not None:
        sx, sw = skip
        csk = sx.shape[-1]
        in_specs += [
            pl.BlockSpec((None, m, csk), lambda i, j: (i, 0, 0)),
            pl.BlockSpec((csk, tco), lambda i, j: (0, j)),
        ]
        args += [sx.reshape(n, m, csk), sw]
        kernel = functools.partial(_conv3x3_proj_kernel, relu=relu)
    else:
        kernel = functools.partial(_conv3x3_kernel, relu=relu)

    out = pl.pallas_call(
        kernel,
        out_shape=jax.ShapeDtypeStruct((n, m, cout), jnp.bfloat16),
        grid=(n, cout // tco),
        in_specs=in_specs,
        out_specs=pl.BlockSpec((None, m, tco), lambda i, j: (i, 0, j)),
        scratch_shapes=[pltpu.VMEM((m, tco), jnp.float32)],
        compiler_params=_compiler_params(("parallel", "parallel")),
    )(*args)
    return out.reshape(n, h, w, cout)


# ----------------------------------------------------------------------------
# im2col fallback path (stride-2 convs, the 4x4 layer4 convs, and the stem):
# bf16 patches + bf16 weights, single fused MXU matmul with f32 epilogue.
# ----------------------------------------------------------------------------
def _mm_kernel(x_ref, w_ref, s_ref, b_ref, o_ref, *, relu):
    acc = jnp.dot(x_ref[...], w_ref[...], preferred_element_type=jnp.float32)
    acc = acc * s_ref[...] + b_ref[...]
    if relu:
        acc = jnp.maximum(acc, 0.0)
    o_ref[...] = acc.astype(o_ref.dtype)


def _mm_res_kernel(x_ref, w_ref, s_ref, b_ref, r_ref, o_ref, *, relu):
    acc = jnp.dot(x_ref[...], w_ref[...], preferred_element_type=jnp.float32)
    acc = acc * s_ref[...] + b_ref[...] + r_ref[...].astype(jnp.float32)
    if relu:
        acc = jnp.maximum(acc, 0.0)
    o_ref[...] = acc.astype(o_ref.dtype)


def _mm_proj_kernel(x_ref, w_ref, s_ref, b_ref, sx_ref, sw_ref, o_ref, *, relu):
    acc = jnp.dot(x_ref[...], w_ref[...], preferred_element_type=jnp.float32)
    skip = jnp.dot(sx_ref[...], sw_ref[...], preferred_element_type=jnp.float32)
    acc = acc * s_ref[...] + b_ref[...] + skip
    if relu:
        acc = jnp.maximum(acc, 0.0)
    o_ref[...] = acc.astype(o_ref.dtype)


def _im2col(x, kh, kw, stride, pad):
    n, h, w, c = x.shape
    xp = jnp.pad(x, ((0, 0), (pad, pad), (pad, pad), (0, 0)))
    ho = (h + 2 * pad - kh) // stride + 1
    wo = (w + 2 * pad - kw) // stride + 1
    taps = []
    for i in range(kh):
        for j in range(kw):
            taps.append(xp[:, i:i + stride * ho:stride, j:j + stride * wo:stride, :])
    p = jnp.stack(taps, axis=3)  # (n, ho, wo, kh*kw, c)
    return p.reshape(n * ho * wo, kh * kw * c), (n, ho, wo)


def _pick_tile_m(m):
    # Largest tile (<=1024) that divides M while keeping >=2 grid steps (v7x
    # megacore); fall back to a single full-size step if M is too small/odd.
    for t in (1024, 512, 256, 128, 64, 32, 16, 8):
        if m % t == 0 and m // t >= 2:
            return t
    for t in (1024, 512, 256, 128, 64, 32, 16, 8):
        if m % t == 0:
            return t
    return m


def _conv_im2col(x, w4, scale, bias, stride, *, relu, residual, skip):
    kh, kw, cin, cout = w4.shape
    pad = kh // 2
    patches, (n, ho, wo) = _im2col(x, kh, kw, stride, pad)
    k = kh * kw * cin
    w2d = w4.reshape(k, cout)
    m = n * ho * wo
    tm = _pick_tile_m(m)
    scale2 = scale.reshape(1, cout)
    bias2 = bias.reshape(1, cout)

    in_specs = [
        pl.BlockSpec((tm, k), lambda i: (i, 0)),
        pl.BlockSpec((k, cout), lambda i: (0, 0)),
        pl.BlockSpec((1, cout), lambda i: (0, 0)),
        pl.BlockSpec((1, cout), lambda i: (0, 0)),
    ]
    args = [patches, w2d, scale2, bias2]
    if residual is not None:
        in_specs.append(pl.BlockSpec((tm, cout), lambda i: (i, 0)))
        args.append(residual.reshape(m, cout))
        kernel = functools.partial(_mm_res_kernel, relu=relu)
    elif skip is not None:
        sx, sw = skip
        csk = sx.shape[-1]
        in_specs += [
            pl.BlockSpec((tm, csk), lambda i: (i, 0)),
            pl.BlockSpec((csk, cout), lambda i: (0, 0)),
        ]
        args += [sx.reshape(m, csk), sw]
        kernel = functools.partial(_mm_proj_kernel, relu=relu)
    else:
        kernel = functools.partial(_mm_kernel, relu=relu)

    out = pl.pallas_call(
        kernel,
        out_shape=jax.ShapeDtypeStruct((m, cout), jnp.bfloat16),
        grid=(m // tm,),
        in_specs=in_specs,
        out_specs=pl.BlockSpec((tm, cout), lambda i: (i, 0)),
        compiler_params=_compiler_params(("parallel",)),
    )(*args)
    return out.reshape(n, ho, wo, cout)


# ----------------------------------------------------------------------------
# Conv dispatcher: fused in-kernel-tap conv for stride-1 3x3 with 128-aligned
# channels and sublane-friendly width, im2col matmul otherwise (or if Mosaic
# rejects the fused lowering on this TPU generation).
# ----------------------------------------------------------------------------
_FUSED_CONV_DISABLED = set()


def conv_bn_act(x, w4, scale, bias, stride, relu=True, residual=None, skip=None):
    n, h, w, cin = x.shape
    cout = w4.shape[-1]
    mode = "res" if residual is not None else ("proj" if skip is not None else "plain")
    key = (h, w, cin, cout, mode)
    use_fused = (
        stride == 1
        and w4.shape[0] == 3
        and w4.shape[1] == 3
        and w % 8 == 0
        and cin % LANE == 0
        and cout % LANE == 0
        and key not in _FUSED_CONV_DISABLED
    )
    if use_fused:
        try:
            return _conv3x3_s1_fused(
                x, w4, scale, bias, relu=relu, residual=residual, skip=skip
            )
        except Exception:
            # Fused tap-accumulation kernel did not lower for this shape on this
            # TPU generation; fall back to the im2col matmul path.
            _FUSED_CONV_DISABLED.add(key)
    return _conv_im2col(
        x, w4, scale, bias, stride, relu=relu, residual=residual, skip=skip
    )


def residual_block(x, bp, stride):
    out = conv_bn_act(x, bp["w1"], bp["s1"], bp["b1"], stride, relu=True)
    if "skip_w" in bp:
        # 1x1 projection skip (no BN), stride s, pad 0 -> subsample, fused into
        # conv2's kernel as an extra matmul term.
        skip_x = x[:, ::stride, ::stride, :]
        return conv_bn_act(out, bp["w2"], bp["s2"], bp["b2"], 1, relu=True,
                           skip=(skip_x, bp["skip_w"]))
    # identity skip: residual add + final ReLU fused into conv2's kernel.
    return conv_bn_act(out, bp["w2"], bp["s2"], bp["b2"], 1, relu=True, residual=x)


# ----------------------------------------------------------------------------
# AvgPool (global over the remaining 4x4 window, 1/16 pre-folded into fc_w)
# fused with the Linear head.
# ----------------------------------------------------------------------------
def _pool_fc_kernel(x_ref, w_ref, b_ref, o_ref):
    pooled = jnp.sum(x_ref[...].astype(jnp.float32), axis=1)  # (N, C)
    o_ref[...] = (
        jnp.dot(pooled, w_ref[...], preferred_element_type=jnp.float32) + b_ref[...]
    )


def pool_fc(x_flat, w, b):
    n, hw, c = x_flat.shape
    nc = w.shape[1]
    return pl.pallas_call(
        _pool_fc_kernel,
        out_shape=jax.ShapeDtypeStruct((n, nc), jnp.float32),
        grid=(1,),
        in_specs=[
            pl.BlockSpec((n, hw, c), lambda i: (0, 0, 0)),
            pl.BlockSpec((c, nc), lambda i: (0, 0)),
            pl.BlockSpec((1, nc), lambda i: (0, 0)),
        ],
        out_specs=pl.BlockSpec((n, nc), lambda i: (0, 0)),
        compiler_params=_compiler_params(None),
    )(x_flat, w, b.reshape(1, nc))


# ----------------------------------------------------------------------------
# Deterministic parameter initialization (synthetic, mirrors module shapes),
# with eval-mode BatchNorm folded into (scale, bias) and channels zero-padded
# to multiples of 128 so padded lanes stay exactly zero through the network.
# ----------------------------------------------------------------------------
def _make_conv(key, kh, kw, cin, cout):
    std = (2.0 / (kh * kw * cin)) ** 0.5
    return (std * jax.random.normal(key, (kh, kw, cin, cout))).astype(jnp.float32)


def _make_bn(key, c, eps=1e-5):
    k1, k2, k3, k4 = jax.random.split(key, 4)
    gamma = 1.0 + 0.1 * jax.random.normal(k1, (c,))
    beta = 0.1 * jax.random.normal(k2, (c,))
    mean = 0.1 * jax.random.normal(k3, (c,))
    var = 1.0 + 0.1 * jax.random.uniform(k4, (c,))
    scale = gamma / jnp.sqrt(var + eps)
    bias = beta - mean * scale
    return scale.astype(jnp.float32), bias.astype(jnp.float32)


def _round_up(c, m=LANE):
    return ((c + m - 1) // m) * m


def _pad_axis(x, axis, target):
    if x.shape[axis] == target:
        return x
    widths = [(0, 0)] * x.ndim
    widths[axis] = (0, target - x.shape[axis])
    return jnp.pad(x, widths)


def init_params(
    key,
    num_classes=10,
    layers=(2, 2, 2, 2),
    channels=(48, 96, 192, 320),
    kernel_size=3,
    skip_kernel_size=1,
    pool_size=4,
):
    # TODO(synk): only skip_kernel_size == 1 (the module default) is supported by
    # the fused projection path.
    assert skip_kernel_size == 1
    keys = iter(jax.random.split(key, 256))
    nk = lambda: next(keys)
    cp = [_round_up(c) for c in channels]  # (128, 128, 256, 384)

    params = {"num_classes": num_classes}

    w = _make_conv(nk(), 3, 3, 3, channels[0])
    s, b = _make_bn(nk(), channels[0])
    params["stem_w"] = _pad_axis(w, 3, cp[0]).astype(jnp.bfloat16)
    params["stem_s"] = _pad_axis(s, 0, cp[0])
    params["stem_b"] = _pad_axis(b, 0, cp[0])

    blocks = []
    in_c, in_cp = channels[0], cp[0]
    for li, (out_c, nb) in enumerate(zip(channels, layers)):
        out_cp = cp[li]
        stride0 = 1 if li == 0 else 2
        for s_ in [stride0] + [1] * (nb - 1):
            bp = {}
            w1 = _make_conv(nk(), kernel_size, kernel_size, in_c, out_c)
            s1, b1 = _make_bn(nk(), out_c)
            w2 = _make_conv(nk(), kernel_size, kernel_size, out_c, out_c)
            s2, b2 = _make_bn(nk(), out_c)
            bp["w1"] = _pad_axis(_pad_axis(w1, 2, in_cp), 3, out_cp).astype(jnp.bfloat16)
            bp["s1"] = _pad_axis(s1, 0, out_cp)
            bp["b1"] = _pad_axis(b1, 0, out_cp)
            bp["w2"] = _pad_axis(_pad_axis(w2, 2, out_cp), 3, out_cp).astype(jnp.bfloat16)
            bp["s2"] = _pad_axis(s2, 0, out_cp)
            bp["b2"] = _pad_axis(b2, 0, out_cp)
            if s_ != 1 or in_c != out_c:
                wsk = _make_conv(nk(), 1, 1, in_c, out_c).reshape(in_c, out_c)
                bp["skip_w"] = _pad_axis(_pad_axis(wsk, 0, in_cp), 1, out_cp).astype(
                    jnp.bfloat16
                )
            blocks.append((bp, s_))
            in_c, in_cp = out_c, out_cp
    params["blocks"] = blocks

    hw_pool = pool_size * pool_size  # AvgPool2d(4) on the final 4x4 map
    fc_std = (1.0 / channels[-1]) ** 0.5
    fc_w = fc_std * jax.random.normal(nk(), (channels[-1], num_classes))
    fc_b = fc_std * jax.random.normal(nk(), (num_classes,))
    ncp = _round_up(num_classes)
    params["fc_w"] = _pad_axis(
        _pad_axis((fc_w / hw_pool).astype(jnp.float32), 0, cp[-1]), 1, ncp
    )
    params["fc_b"] = _pad_axis(fc_b.astype(jnp.float32), 0, ncp)
    return params


# ----------------------------------------------------------------------------
# Forward pass (matches CustomResNet18.forward; 32x32 input so the final 4x4
# map makes AvgPool2d(4) a global pool, folded into the FC head).
# ----------------------------------------------------------------------------
def forward(params, x_nchw):
    x = jnp.transpose(x_nchw, (0, 2, 3, 1)).astype(jnp.bfloat16)  # NCHW -> NHWC
    x = conv_bn_act(x, params["stem_w"], params["stem_s"], params["stem_b"], 1,
                    relu=True)
    for bp, stride in params["blocks"]:
        x = residual_block(x, bp, stride)
    n, h, w, c = x.shape
    logits = pool_fc(x.reshape(n, h * w, c), params["fc_w"], params["fc_b"])
    return logits[:, : params["num_classes"]]


if __name__ == "__main__":
    key = jax.random.PRNGKey(0)
    kp, kx = jax.random.split(key)
    # 32x32 input so that after three stride-2 stages spatial is 4x4,
    # matching AvgPool2d(kernel_size=4).
    x = jax.random.normal(kx, (2, 3, 32, 32), dtype=jnp.float32)
    params = init_params(kp)
    out = forward(params, x)
    out = jax.block_until_ready(out)
    assert out.shape == (2, 10), out.shape
    print("KERNEL_OK")
</pallas_src>

<mosaic_0001>
module attributes {stable_mosaic.version = 11 : i64} {
  func.func @_mm_kernel(%arg0: i32, %arg1: memref<1024x27xbf16, #tpu.memory_space<vmem>>, %arg2: memref<27x128xbf16, #tpu.memory_space<vmem>>, %arg3: memref<1x128xf32, #tpu.memory_space<vmem>>, %arg4: memref<1x128xf32, #tpu.memory_space<vmem>>, %arg5: memref<1024x128xbf16, #tpu.memory_space<vmem>>) attributes {dimension_semantics = [#tpu.dimension_semantics<parallel>], iteration_bounds = array<i64: 2>, scalar_prefetch = 0 : i64, scratch_operands = 0 : i64, tpu.core_type = #tpu.core_type<tc>, window_params = [{transform_indices = @transform_0, window_bounds = array<i64: 1024, 27>}, {pipeline_mode = #tpu.pipeline_mode<synchronous>, transform_indices = @transform_1, window_bounds = array<i64: 27, 128>}, {pipeline_mode = #tpu.pipeline_mode<synchronous>, transform_indices = @transform_2, window_bounds = array<i64: 1, 128>}, {pipeline_mode = #tpu.pipeline_mode<synchronous>, transform_indices = @transform_3, window_bounds = array<i64: 1, 128>}, {transform_indices = @transform_4, window_bounds = array<i64: 1024, 128>}]} {
    %c0 = arith.constant 0 : index
    %c0_0 = arith.constant 0 : index
    %0 = vector.load %arg1[%c0, %c0_0] : memref<1024x27xbf16, #tpu.memory_space<vmem>>, vector<1024x27xbf16>
    %c0_1 = arith.constant 0 : index
    %c0_2 = arith.constant 0 : index
    %1 = vector.load %arg2[%c0_1, %c0_2] : memref<27x128xbf16, #tpu.memory_space<vmem>>, vector<27x128xbf16>
    %cst = arith.constant dense<0.000000e+00> : vector<1024x128xf32>
    %2 = tpu.matmul %0, %1, %cst {dimension_numbers = #tpu.dot_dimension_numbers<[1], [0], [0], [1], [0, 0, 1, 1], [], []>} : vector<1024x27xbf16>, vector<27x128xbf16>, vector<1024x128xf32> -> vector<1024x128xf32>
    %c0_3 = arith.constant 0 : index
    %c0_4 = arith.constant 0 : index
    %3 = vector.load %arg3[%c0_3, %c0_4] : memref<1x128xf32, #tpu.memory_space<vmem>>, vector<1x128xf32>
    %4 = vector.broadcast %3 : vector<1x128xf32> to vector<1024x128xf32>
    %5 = arith.mulf %2, %4 : vector<1024x128xf32>
    %c0_5 = arith.constant 0 : index
    %c0_6 = arith.constant 0 : index
    %6 = vector.load %arg4[%c0_5, %c0_6] : memref<1x128xf32, #tpu.memory_space<vmem>>, vector<1x128xf32>
    %7 = vector.broadcast %6 : vector<1x128xf32> to vector<1024x128xf32>
    %8 = arith.addf %5, %7 : vector<1024x128xf32>
    %cst_7 = arith.constant 0.000000e+00 : f32
    %9 = vector.broadcast %cst_7 : f32 to vector<1024x128xf32>
    %10 = arith.maximumf %8, %9 : vector<1024x128xf32>
    %11 = arith.truncf %10 : vector<1024x128xf32> to vector<1024x128xbf16>
    %c0_8 = arith.constant 0 : index
    %c0_9 = arith.constant 0 : index
    %12 = vector.load %arg5[%c0_8, %c0_9] : memref<1024x128xbf16, #tpu.memory_space<vmem>>, vector<1024x128xbf16>
    tpu.vector_store %arg5[%c0_8, %c0_9], %11 {strides = array<i32>} : memref<1024x128xbf16, #tpu.memory_space<vmem>>, vector<1024x128xbf16>,
    return
  }
  func.func @transform_0(%arg0: i32) -> (i32, i32) {
    %c0_i32 = arith.constant 0 : i32
    %c0_i32_0 = arith.constant 0 : i32
    return %arg0, %c0_i32 : i32, i32
  }
  func.func @transform_1(%arg0: i32) -> (i32, i32) {
    %c0_i32 = arith.constant 0 : i32
    %c0_i32_0 = arith.constant 0 : i32
    %c0_i32_1 = arith.constant 0 : i32
    return %c0_i32, %c0_i32_0 : i32, i32
  }
  func.func @transform_2(%arg0: i32) -> (i32, i32) {
    %c0_i32 = arith.constant 0 : i32
    %c0_i32_0 = arith.constant 0 : i32
    %c0_i32_1 = arith.constant 0 : i32
    return %c0_i32, %c0_i32_0 : i32, i32
  }
  func.func @transform_3(%arg0: i32) -> (i32, i32) {
    %c0_i32 = arith.constant 0 : i32
    %c0_i32_0 = arith.constant 0 : i32
    %c0_i32_1 = arith.constant 0 : i32
    return %c0_i32, %c0_i32_0 : i32, i32
  }
  func.func @transform_4(%arg0: i32) -> (i32, i32) {
    %c0_i32 = arith.constant 0 : i32
    %c0_i32_0 = arith.constant 0 : i32
    return %arg0, %c0_i32 : i32, i32
  }
}

</mosaic_0001>

<bundles_post_ra>
// kernel: tpu_custom_call.1
= control target key start
LH: loop header
LB: loop body
LE: loop exit
PB: predicated region body
PF: predicated region fallthrough
CT: control target
= control target key end

     0   :  { %9 = vsyncpa [#allocation3], 0  ;;  %s3422_s0 = inlined_call_operand.vmem [shape: bf16[2048,27], index: 0, kind: input, shape index: {}]   ;;  %s3423_s1 = inlined_call_operand.vmem [shape: bf16[27,128], index: 1, kind: input, shape index: {}]   ;;  %s3424_s2 = inlined_call_operand.vmem [shape: f32[1,128], index: 2, kind: input, shape index: {}]   ;;  %s3425_s3 = inlined_call_operand.vmem [shape: f32[1,128], index: 3, kind: input, shape index: {}]   ;;  %s3426_s4 = inlined_call_operand.hbm [shape: bf16[2048,128], index: 4, kind: output, shape index: {}]  }
   0x1   :  { %11 = vsyncpa [#allocation3 + $0x1], 0  ;;  %s2852_s15 = smov 0   ;;  %s2854_s16 = smov 0  }
   0x2   :  { %s2856_s17 = smov 0   ;;  %s2858_s18 = smov 0  }
   0x3 LB: > { %s2873_s19 = sadd.s32 4294967295, %s2822_s18   ;;  %s1918_s20 = sadd.s32 4294967294, %s2822_s18   ;;  %s2822_s18 = sphi %s2858_s18, %s3432_s18   ;;  %s2818_s17 = sphi %s2856_s17, %s3431_s17   ;;  %s2814_s16 = sphi %s2854_s16, %s3430_s16   ;;  %s2810_s15 = sphi %s2852_s15, %s3429_s15  }
   0x4   : > { %s2877_s21 = sadd.s32 1, %s2822_s18   ;;  %s113_s22 = sadd.s32 1, %s2818_s17 }
   0x5   : > { %s110_s23 = ssub.s32 %s2822_s18, %s2877_s21  ;;  %p123_p0 = scmp.ne.s32.totalorder %s2818_s17, %s2814_s16 }
   0x6   : > { %p111_p1 = scmp.eq.s32.totalorder %s110_s23, 0  ;;  %p124_p2 = scmp.eq.s32.totalorder %s2873_s19, 1 }
   0x7   : > { %p129_p3 = scmp.ne.s32.totalorder %s2814_s16, %s2810_s15  ;;  %p130_p4 = scmp.eq.s32.totalorder %s1918_s20, 1 }
   0x8   : > { %s2888_s24 = scalar_select %p111_p1, %s2818_s17, %s113_s22  }
   0x9   : > { %p2890_p5 = por %p124_p2, %p123_p0  ;;  %p2894_p6 = por %p130_p4, %p129_p3 }
   0xa   : > { %p1921_p7 = scmp.ge.s32.totalorder %s2822_s18, 1  ;;  %p166_p8 = scmp.lt.s32.totalorder %s2822_s18, 3 }
   0xc   : > { %p167_p9 = pnand %p1921_p7, %p166_p8 }
   0xd   : > { %s1923_s5 = sshll.u32 (!%p167_p9), %s2873_s19, 7  ;;  %s189_s22 = sand.u32 (!%p167_p9), 1, %s2814_s16  }
   0xe   : > { %170 = sbr.rel (%p167_p9) target bundleno = 426 (0x1aa), region = 36  ;;  %p193_p10 = scmp.lt.s32.totalorder (!%p167_p9), %s1923_s5, 255 }
   0xf   : > { %s1922_s23 = sshll.u32 (!%p167_p9), %s189_s22, 9  ;;  %s2324_s6 = sshll.u32 (!%p167_p9), %s2873_s19, 9 }
  0x10   : > { %s3018_s27 = scalar_lea.vmem (!%p167_p9), [#allocation2], %s1922_s23  ;;  %s1852_s9 = scalar_lea.hbm (!%p167_p9), %s3426_s4, %s2324_s6 }
  0x11   : > { %s1853_s19 = sshll.u32 (!%p167_p9), %s3018_s27, 4  ;;  %s1855_s10 = sshll.u32 (!%p167_p9), %s1852_s9, 4  ;;  %s1854_s19 = int_to_ptr.vmem [resolvable:$true] %s1853_s19  ;;  %s1856_s10 = int_to_ptr.hbm [resolvable:$true] %s1855_s10 }
  0x12   : > { %s2774_s12 = sshra.s32 (!%p167_p9), %s1856_s10, 4  ;;  %s2780_s23 = scalar_lea.hbm (!%p167_p9), %s3426_s4, 1024  ;;  %s2775_s12 = int_to_ptr.hbm [resolvable:$true] %s2774_s12 }
  0x13   : > { %v2187_v0 = vld [vmem:[%s3423_s1 + $0x8] sm:$0xf]  ;;  %v2323_v1 = vld [vmem:[%s3423_s1 + $0x8] sm:$0x30]  ;;  %vm856_vm0 = vcmask 1044480   ;;  %vm857_vm1 = vcmask 1045504   ;;  %p2781_p0 = scmp.lt.s32.totalorder %s2775_s12, %s3426_s4 }
  0x14   : > { %v2188_v2 = vor.u32 %v2323_v1, %v2187_v0  ;;  %v2824_v3 = vmov 65535   ;;  %s3434_s5 = smov (!%p193_p10, %s1923_s5), 255  ;;  %v2322_v7 = vld [vmem:[%s3423_s1] sm:$0xff]  ;;  %vm663_vm2 = vcmask 220160   ;;  %s2776_s13 = scalar_lea.hbm %s2775_s12, 512 }
  0x15   : > { %v858_v4 = vsel %vm856_vm0, 4294967295, %v2824_v3  ;;  %s1924_s8 = sshll.u32 %s3434_s5, 2  ;;  %v2986_v46 = vld [vmem:[%s3424_s2] ss:$0 sm:$0xff]  ;;  %p2777_p11 = scmp.ne.s32.totalorder %s2775_s12, %s2776_s13 }
  0x16   : > { %v859_v5 = vsel %vm857_vm1, %v858_v4, 0  ;;  %s2913_s11 = scalar_lea.vmem %s3422_s0, %s1924_s8  ;;  %v2996_v48 = vld [vmem:[%s3425_s3] ss:$0 sm:$0xff]  ;;  %p2782_p1 = scmp.lt.s32.totalorder %s2780_s23, %s2776_s13 }
  0x17   : > { %v861_v6 = vand.u32 %v2188_v2, %v859_v5  ;;  %v2258_v8 = vld [vmem:[%s2913_s11] sm:$0xff]  ;;  %v2259_v12 = vld [vmem:[%s2913_s11 + $0x8] sm:$0xff]  ;;  %v2260_v16 = vld [vmem:[%s2913_s11 + $0x10] sm:$0xff]  ;;  %p2778_p12 = pnand %p2777_p11, %p2890_p5 }
  0x18   : > { %v2274_v9 = vld [vmem:[%s2913_s11 + $0x80] sm:$0xff]  ;;  %v2275_v13 = vld [vmem:[%s2913_s11 + $0x88] sm:$0xff]  ;;  %v2276_v17 = vld [vmem:[%s2913_s11 + $0x90] sm:$0xff]  ;;  %p2783_p2 = por %p2782_p1, %p2781_p0 }
  0x19   : > { %869 = vmatpush.bf16.msra.mxu0 %v861_v6  ;;  %2708 = vmatpush.bf16.msra.mxu1 %v861_v6  ;;  %v2290_v10 = vld [vmem:[%s2913_s11 + $0x100] sm:$0xff]  ;;  %v2291_v14 = vld [vmem:[%s2913_s11 + $0x108] sm:$0xff]  ;;  %v2292_v18 = vld [vmem:[%s2913_s11 + $0x110] sm:$0xff]  ;;  %p2779_p13 = pneg %p2778_p12 }
  0x1a   : > { %2709 = vmatpush.bf16.msra.mxu2 %v861_v6  ;;  %2710 = vmatpush.bf16.msra.mxu3 %v861_v6  ;;  %v2306_v11 = vld [vmem:[%s2913_s11 + $0x180] sm:$0xff]  ;;  %v2307_v15 = vld [vmem:[%s2913_s11 + $0x188] sm:$0xff]  ;;  %v2308_v19 = vld [vmem:[%s2913_s11 + $0x190] sm:$0xff] }
  0x1b   : > { %v2261_v20 = vld [vmem:[%s2913_s11 + $0x18] sm:$0xff]  ;;  %v2262_v24 = vld [vmem:[%s2913_s11 + $0x20] sm:$0xff]  ;;  %v2263_v28 = vld [vmem:[%s2913_s11 + $0x28] sm:$0xff]  ;;  %p2784_p3 = pnand %p2783_p2, %p2779_p13 }
  0x1c   : > { %v2277_v21 = vld [vmem:[%s2913_s11 + $0x98] sm:$0xff]  ;;  %v2278_v25 = vld [vmem:[%s2913_s11 + $0xa0] sm:$0xff]  ;;  %v2279_v29 = vld [vmem:[%s2913_s11 + $0xa8] sm:$0xff] }
  0x1d   : > { %870 = vmatpush.bf16.msra.mxu0 %v2322_v7  ;;  %2711 = vmatpush.bf16.msra.mxu1 %v2322_v7  ;;  %v2293_v22 = vld [vmem:[%s2913_s11 + $0x118] sm:$0xff]  ;;  %v2294_v26 = vld [vmem:[%s2913_s11 + $0x120] sm:$0xff]  ;;  %v2295_v30 = vld [vmem:[%s2913_s11 + $0x128] sm:$0xff] }
  0x1e   : > { %2712 = vmatpush.bf16.msra.mxu2 %v2322_v7  ;;  %2713 = vmatpush.bf16.msra.mxu3 %v2322_v7  ;;  %v2309_v23 = vld [vmem:[%s2913_s11 + $0x198] sm:$0xff]  ;;  %v2310_v27 = vld [vmem:[%s2913_s11 + $0x1a0] sm:$0xff]  ;;  %v2311_v31 = vld [vmem:[%s2913_s11 + $0x1a8] sm:$0xff] }
  0x1f   : > { %v2264_v32 = vld [vmem:[%s2913_s11 + $0x30] sm:$0xff]  ;;  %v2265_v36 = vld [vmem:[%s2913_s11 + $0x38] sm:$0xff]  ;;  %v2266_v40 = vld [vmem:[%s2913_s11 + $0x40] sm:$0xff] }
  0x20   : > { %2189 = vmatmul.msk.bf16.vlgmr.msra.gmra.mxu0 %vm663_vm2, %v2258_v8  ;;  %2205 = vmatmul.msk.bf16.vlgmr.msra.gmra.mxu1 %vm663_vm2, %v2274_v9  ;;  %v2280_v33 = vld [vmem:[%s2913_s11 + $0xb0] sm:$0xff]  ;;  %v2281_v37 = vld [vmem:[%s2913_s11 + $0xb8] sm:$0xff]  ;;  %v2282_v41 = vld [vmem:[%s2913_s11 + $0xc0] sm:$0xff] }
  0x21   : > { %2221 = vmatmul.msk.bf16.vlgmr.msra.gmra.mxu2 %vm663_vm2, %v2290_v10  ;;  %2237 = vmatmul.msk.bf16.vlgmr.msra.gmra.mxu3 %vm663_vm2, %v2306_v11  ;;  %v2296_v34 = vld [vmem:[%s2913_s11 + $0x130] sm:$0xff]  ;;  %v2297_v38 = vld [vmem:[%s2913_s11 + $0x138] sm:$0xff]  ;;  %v2298_v44 = vld [vmem:[%s2913_s11 + $0x140] sm:$0xff] }
  0x22   : > { %v2312_v35 = vld [vmem:[%s2913_s11 + $0x1b0] sm:$0xff]  ;;  %v2313_v39 = vld [vmem:[%s2913_s11 + $0x1b8] sm:$0xff]  ;;  %v2314_v45 = vld [vmem:[%s2913_s11 + $0x1c0] sm:$0xff] }
  0x23   : > { %v2267_v6 = vld [vmem:[%s2913_s11 + $0x48] sm:$0xff] }
  0x24   : > { %v2283_v7 = vld [vmem:[%s2913_s11 + $0xc8] sm:$0xff] }
  0x30   : > { %2190 = vmatmul.msk.bf16.gmra.mxu0 %vm663_vm2, %v2259_v12  ;;  %2206 = vmatmul.msk.bf16.gmra.mxu1 %vm663_vm2, %v2275_v13 }
  0x31   : > { %2222 = vmatmul.msk.bf16.gmra.mxu2 %vm663_vm2, %v2291_v14  ;;  %2238 = vmatmul.msk.bf16.gmra.mxu3 %vm663_vm2, %v2307_v15  ;;  %v2299_v14 = vld [vmem:[%s2913_s11 + $0x148] sm:$0xff] }
  0x32   : > { %v2315_v15 = vld [vmem:[%s2913_s11 + $0x1c8] sm:$0xff] }
  0x40   : > { %2191 = vmatmul.msk.bf16.gmra.mxu0 %vm663_vm2, %v2260_v16  ;;  %2207 = vmatmul.msk.bf16.gmra.mxu1 %vm663_vm2, %v2276_v17 }
  0x41   : > { %2223 = vmatmul.msk.bf16.gmra.mxu2 %vm663_vm2, %v2292_v18  ;;  %2239 = vmatmul.msk.bf16.gmra.mxu3 %vm663_vm2, %v2308_v19 }
  0x50   : > { %2192 = vmatmul.msk.bf16.gmra.mxu0 %vm663_vm2, %v2261_v20  ;;  %2208 = vmatmul.msk.bf16.gmra.mxu1 %vm663_vm2, %v2277_v21 }
  0x51   : > { %2224 = vmatmul.msk.bf16.gmra.mxu2 %vm663_vm2, %v2293_v22  ;;  %2240 = vmatmul.msk.bf16.gmra.mxu3 %vm663_vm2, %v2309_v23 }
  0x60   : > { %2193 = vmatmul.msk.bf16.gmra.mxu0 %vm663_vm2, %v2262_v24  ;;  %2209 = vmatmul.msk.bf16.gmra.mxu1 %vm663_vm2, %v2278_v25 }
  0x61   : > { %2225 = vmatmul.msk.bf16.gmra.mxu2 %vm663_vm2, %v2294_v26  ;;  %2241 = vmatmul.msk.bf16.gmra.mxu3 %vm663_vm2, %v2310_v27 }
  0x70   : > { %2194 = vmatmul.msk.bf16.gmra.mxu0 %vm663_vm2, %v2263_v28  ;;  %2210 = vmatmul.msk.bf16.gmra.mxu1 %vm663_vm2, %v2279_v29 }
  0x71   : > { %2226 = vmatmul.msk.bf16.gmra.mxu2 %vm663_vm2, %v2295_v30  ;;  %2242 = vmatmul.msk.bf16.gmra.mxu3 %vm663_vm2, %v2311_v31 }
  0x80   : > { %2195 = vmatmul.msk.bf16.gmra.mxu0 %vm663_vm2, %v2264_v32  ;;  %2211 = vmatmul.msk.bf16.gmra.mxu1 %vm663_vm2, %v2280_v33 }
  0x81   : > { %2227 = vmatmul.msk.bf16.gmra.mxu2 %vm663_vm2, %v2296_v34  ;;  %2243 = vmatmul.msk.bf16.gmra.mxu3 %vm663_vm2, %v2312_v35 }
  0x90   : > { %2196 = vmatmul.msk.bf16.gmra.mxu0 %vm663_vm2, %v2265_v36  ;;  %2212 = vmatmul.msk.bf16.gmra.mxu1 %vm663_vm2, %v2281_v37 }
  0x91   : > { %2228 = vmatmul.msk.bf16.gmra.mxu2 %vm663_vm2, %v2297_v38  ;;  %2244 = vmatmul.msk.bf16.gmra.mxu3 %vm663_vm2, %v2313_v39 }
  0x9d   : > { %v872_v42 = vpop.f32.mrf.mxu0  ;;  %v952_v43 = vpop.f32.mrf.mxu1 }
  0x9e   : > { %v1196_v47 = vmul.f32 %v2986_v46, %v872_v42  ;;  %v1228_v49 = vmul.f32 %v2986_v46, %v952_v43 }
  0xa0   : > { %2197 = vmatmul.msk.bf16.gmra.mxu0 %vm663_vm2, %v2266_v40  ;;  %2213 = vmatmul.msk.bf16.gmra.mxu1 %vm663_vm2, %v2282_v41  ;;  %v1328_v54 = vadd.f32 %v2996_v48, %v1196_v47  ;;  %v1360_v55 = vadd.f32 %v2996_v48, %v1228_v49  ;;  %v2268_v47 = vld [vmem:[%s2913_s11 + $0x50] sm:$0xff] }
  0xa1   : > { %2229 = vmatmul.msk.bf16.gmra.mxu2 %vm663_vm2, %v2298_v44  ;;  %2245 = vmatmul.msk.bf16.gmra.mxu3 %vm663_vm2, %v2314_v45  ;;  %v2284_v49 = vld [vmem:[%s2913_s11 + $0xd0] sm:$0xff] }
  0xa2   : > { %v1456_v62 = vmax.f32 %v1328_v54, 0.0  ;;  %v1488_v63 = vmax.f32 %v1360_v55, 0.0 }
  0xa4   : > { %v1032_v50 = vpop.f32.mrf.mxu2  ;;  %v1112_v51 = vpop.f32.mrf.mxu3 }
  0xa5   : > { %v874_v52 = vpop.f32.mrf.mxu0  ;;  %v954_v53 = vpop.f32.mrf.mxu1  ;;  %v1260_v60 = vmul.f32 %v2986_v46, %v1032_v50  ;;  %v1292_v61 = vmul.f32 %v2986_v46, %v1112_v51 }
  0xa6   : > { %v1197_v56 = vmul.f32 %v2986_v46, %v874_v52  ;;  %v1229_v57 = vmul.f32 %v2986_v46, %v954_v53 }
  0xa7   : > { %v1392_v8 = vadd.f32 %v2996_v48, %v1260_v60  ;;  %v1424_v9 = vadd.f32 %v2996_v48, %v1292_v61 }
  0xa8   : > { %v1329_v58 = vadd.f32 %v2996_v48, %v1197_v56  ;;  %v1361_v59 = vadd.f32 %v2996_v48, %v1229_v57  ;;  %v2300_v56 = vld [vmem:[%s2913_s11 + $0x150] sm:$0xff] }
  0xa9   : > { %v1520_v18 = vmax.f32 %v1392_v8, 0.0  ;;  %v1552_v19 = vmax.f32 %v1424_v9, 0.0  ;;  %v2316_v57 = vld [vmem:[%s2913_s11 + $0x1d0] sm:$0xff] }
  0xaa   : > { %v1457_v0 = vmax.f32 %v1329_v58, 0.0  ;;  %v1489_v1 = vmax.f32 %v1361_v59, 0.0 }
  0xac   : > { %v2328_v2 = vpack.c.bf16 %v1457_v0, %v1456_v62  ;;  %v2408_v3 = vpack.c.bf16 %v1489_v1, %v1488_v63  ;;  %v1034_v4 = vpop.f32.mrf.mxu2  ;;  %v1114_v5 = vpop.f32.mrf.mxu3 }
  0xad   : > { %v1261_v10 = vmul.f32 %v2986_v46, %v1034_v4  ;;  %v1293_v11 = vmul.f32 %v2986_v46, %v1114_v5  ;;  %v877_v12 = vpop.f32.mrf.mxu0  ;;  %v957_v13 = vpop.f32.mrf.mxu1 }
  0xae   : > { %2329 = vst [vmem:[%s3018_s27] sm:$0xff] %v2328_v2   ;;  %v1198_v22 = vmul.f32 %v2986_v46, %v877_v12  ;;  %v1230_v23 = vmul.f32 %v2986_v46, %v957_v13 }
  0xaf   : > { %2660 = vst [vmem:[%s3018_s27 + $0x80] sm:$0xff] %v2408_v3   ;;  %v1393_v16 = vadd.f32 %v2996_v48, %v1261_v10  ;;  %v1425_v17 = vadd.f32 %v2996_v48, %v1293_v11 }
  0xb0   : > { %2198 = vmatmul.msk.bf16.gmra.mxu0 %vm663_vm2, %v2267_v6  ;;  %2214 = vmatmul.msk.bf16.gmra.mxu1 %vm663_vm2, %v2283_v7  ;;  %v1330_v30 = vadd.f32 %v2996_v48, %v1198_v22  ;;  %v1362_v31 = vadd.f32 %v2996_v48, %v1230_v23 }
  0xb1   : > { %v1521_v20 = vmax.f32 %v1393_v16, 0.0  ;;  %v1553_v21 = vmax.f32 %v1425_v17, 0.0  ;;  %2230 = vmatmul.msk.bf16.gmra.mxu2 %vm663_vm2, %v2299_v14  ;;  %2246 = vmatmul.msk.bf16.gmra.mxu3 %vm663_vm2, %v2315_v15 }
  0xb2   : > { %v1458_v38 = vmax.f32 %v1330_v30, 0.0  ;;  %v1490_v39 = vmax.f32 %v1362_v31, 0.0 }
  0xb3   : > { %v2488_v24 = vpack.c.bf16 %v1521_v20, %v1520_v18  ;;  %v2568_v25 = vpack.c.bf16 %v1553_v21, %v1552_v19 }
  0xb4   : > { %v1037_v26 = vpop.f32.mrf.mxu2  ;;  %v1117_v27 = vpop.f32.mrf.mxu3 }
  0xb5   : > { %2676 = vst [vmem:[%s3018_s27 + $0x100] sm:$0xff] %v2488_v24   ;;  %v879_v28 = vpop.f32.mrf.mxu0  ;;  %v959_v29 = vpop.f32.mrf.mxu1  ;;  %v1262_v36 = vmul.f32 %v2986_v46, %v1037_v26  ;;  %v1294_v37 = vmul.f32 %v2986_v46, %v1117_v27  ;;  %v2269_v24 = vld [vmem:[%s2913_s11 + $0x58] sm:$0xff] }
  0xb6   : > { %2692 = vst [vmem:[%s3018_s27 + $0x180] sm:$0xff] %v2568_v25   ;;  %v1199_v32 = vmul.f32 %v2986_v46, %v879_v28  ;;  %v1231_v33 = vmul.f32 %v2986_v46, %v959_v29  ;;  %v2285_v25 = vld [vmem:[%s2913_s11 + $0xd8] sm:$0xff] }
  0xb7   : > { %v1394_v50 = vadd.f32 %v2996_v48, %v1262_v36  ;;  %v1426_v51 = vadd.f32 %v2996_v48, %v1294_v37 }
  0xb8   : > { %v1331_v34 = vadd.f32 %v2996_v48, %v1199_v32  ;;  %v1363_v35 = vadd.f32 %v2996_v48, %v1231_v33  ;;  %v2301_v32 = vld [vmem:[%s2913_s11 + $0x158] sm:$0xff] }
  0xb9   : > { %v1522_v60 = vmax.f32 %v1394_v50, 0.0  ;;  %v1554_v61 = vmax.f32 %v1426_v51, 0.0  ;;  %v2317_v33 = vld [vmem:[%s2913_s11 + $0x1d8] sm:$0xff] }
  0xba   : > { %v1459_v40 = vmax.f32 %v1331_v34, 0.0  ;;  %v1491_v41 = vmax.f32 %v1363_v35, 0.0 }
  0xbc   : > { %v2333_v42 = vpack.c.bf16 %v1459_v40, %v1458_v38  ;;  %v2413_v43 = vpack.c.bf16 %v1491_v41, %v1490_v39  ;;  %v1039_v44 = vpop.f32.mrf.mxu2  ;;  %v1119_v45 = vpop.f32.mrf.mxu3 }
  0xbd   : > { %v1263_v52 = vmul.f32 %v2986_v46, %v1039_v44  ;;  %v1295_v53 = vmul.f32 %v2986_v46, %v1119_v45  ;;  %v882_v54 = vpop.f32.mrf.mxu0  ;;  %v962_v55 = vpop.f32.mrf.mxu1 }
  0xbe   : > { %2645 = vst [vmem:[%s3018_s27 + $0x8] sm:$0xff] %v2333_v42   ;;  %v1200_v0 = vmul.f32 %v2986_v46, %v882_v54  ;;  %v1232_v1 = vmul.f32 %v2986_v46, %v962_v55 }
  0xbf   : > { %2661 = vst [vmem:[%s3018_s27 + $0x88] sm:$0xff] %v2413_v43   ;;  %v1395_v58 = vadd.f32 %v2996_v48, %v1263_v52  ;;  %v1427_v59 = vadd.f32 %v2996_v48, %v1295_v53 }
  0xc0   : > { %2199 = vmatmul.msk.bf16.gmra.mxu0 %vm663_vm2, %v2268_v47  ;;  %2215 = vmatmul.msk.bf16.gmra.mxu1 %vm663_vm2, %v2284_v49  ;;  %v1332_v8 = vadd.f32 %v2996_v48, %v1200_v0  ;;  %v1364_v9 = vadd.f32 %v2996_v48, %v1232_v1 }
  0xc1   : > { %v1523_v62 = vmax.f32 %v1395_v58, 0.0  ;;  %v1555_v63 = vmax.f32 %v1427_v59, 0.0  ;;  %2231 = vmatmul.msk.bf16.gmra.mxu2 %vm663_vm2, %v2300_v56  ;;  %2247 = vmatmul.msk.bf16.gmra.mxu3 %vm663_vm2, %v2316_v57 }
  0xc2   : > { %v1460_v16 = vmax.f32 %v1332_v8, 0.0  ;;  %v1492_v17 = vmax.f32 %v1364_v9, 0.0 }
  0xc3   : > { %v2493_v2 = vpack.c.bf16 %v1523_v62, %v1522_v60  ;;  %v2573_v3 = vpack.c.bf16 %v1555_v63, %v1554_v61 }
  0xc4   : > { %v1042_v4 = vpop.f32.mrf.mxu2  ;;  %v1122_v5 = vpop.f32.mrf.mxu3 }
  0xc5   : > { %2677 = vst [vmem:[%s3018_s27 + $0x108] sm:$0xff] %v2493_v2   ;;  %v884_v6 = vpop.f32.mrf.mxu0  ;;  %v964_v7 = vpop.f32.mrf.mxu1  ;;  %v1264_v14 = vmul.f32 %v2986_v46, %v1042_v4  ;;  %v1296_v15 = vmul.f32 %v2986_v46, %v1122_v5  ;;  %v2270_v2 = vld [vmem:[%s2913_s11 + $0x60] sm:$0xff] }
  0xc6   : > { %2693 = vst [vmem:[%s3018_s27 + $0x188] sm:$0xff] %v2573_v3   ;;  %v1201_v10 = vmul.f32 %v2986_v46, %v884_v6  ;;  %v1233_v11 = vmul.f32 %v2986_v46, %v964_v7  ;;  %v2286_v3 = vld [vmem:[%s2913_s11 + $0xe0] sm:$0xff] }
  0xc7   : > { %v1396_v26 = vadd.f32 %v2996_v48, %v1264_v14  ;;  %v1428_v27 = vadd.f32 %v2996_v48, %v1296_v15 }
  0xc8   : > { %v1333_v12 = vadd.f32 %v2996_v48, %v1201_v10  ;;  %v1365_v13 = vadd.f32 %v2996_v48, %v1233_v11  ;;  %v2302_v10 = vld [vmem:[%s2913_s11 + $0x160] sm:$0xff] }
  0xc9   : > { %v1524_v36 = vmax.f32 %v1396_v26, 0.0  ;;  %v1556_v37 = vmax.f32 %v1428_v27, 0.0  ;;  %v2318_v11 = vld [vmem:[%s2913_s11 + $0x1e0] sm:$0xff] }
  0xca   : > { %v1461_v18 = vmax.f32 %v1333_v12, 0.0  ;;  %v1493_v19 = vmax.f32 %v1365_v13, 0.0 }
  0xcc   : > { %v2338_v20 = vpack.c.bf16 %v1461_v18, %v1460_v16  ;;  %v2418_v21 = vpack.c.bf16 %v1493_v19, %v1492_v17  ;;  %v1044_v22 = vpop.f32.mrf.mxu2  ;;  %v1124_v23 = vpop.f32.mrf.mxu3 }
  0xcd   : > { %v1265_v28 = vmul.f32 %v2986_v46, %v1044_v22  ;;  %v1297_v29 = vmul.f32 %v2986_v46, %v1124_v23  ;;  %v887_v30 = vpop.f32.mrf.mxu0  ;;  %v967_v31 = vpop.f32.mrf.mxu1 }
  0xce   : > { %2646 = vst [vmem:[%s3018_s27 + $0x10] sm:$0xff] %v2338_v20   ;;  %v1202_v40 = vmul.f32 %v2986_v46, %v887_v30  ;;  %v1234_v41 = vmul.f32 %v2986_v46, %v967_v31 }
  0xcf   : > { %2662 = vst [vmem:[%s3018_s27 + $0x90] sm:$0xff] %v2418_v21   ;;  %v1397_v34 = vadd.f32 %v2996_v48, %v1265_v28  ;;  %v1429_v35 = vadd.f32 %v2996_v48, %v1297_v29 }
  0xd0   : > { %2200 = vmatmul.msk.bf16.gmra.mxu0 %vm663_vm2, %v2269_v24  ;;  %2216 = vmatmul.msk.bf16.gmra.mxu1 %vm663_vm2, %v2285_v25  ;;  %v1334_v50 = vadd.f32 %v2996_v48, %v1202_v40  ;;  %v1366_v51 = vadd.f32 %v2996_v48, %v1234_v41 }
  0xd1   : > { %v1525_v38 = vmax.f32 %v1397_v34, 0.0  ;;  %v1557_v39 = vmax.f32 %v1429_v35, 0.0  ;;  %2232 = vmatmul.msk.bf16.gmra.mxu2 %vm663_vm2, %v2301_v32  ;;  %2248 = vmatmul.msk.bf16.gmra.mxu3 %vm663_vm2, %v2317_v33 }
  0xd2   : > { %v1462_v58 = vmax.f32 %v1334_v50, 0.0  ;;  %v1494_v59 = vmax.f32 %v1366_v51, 0.0 }
  0xd3   : > { %v2498_v42 = vpack.c.bf16 %v1525_v38, %v1524_v36  ;;  %v2578_v43 = vpack.c.bf16 %v1557_v39, %v1556_v37 }
  0xd4   : > { %v1047_v44 = vpop.f32.mrf.mxu2  ;;  %v1127_v45 = vpop.f32.mrf.mxu3 }
  0xd5   : > { %2678 = vst [vmem:[%s3018_s27 + $0x110] sm:$0xff] %v2498_v42   ;;  %v889_v47 = vpop.f32.mrf.mxu0  ;;  %v969_v49 = vpop.f32.mrf.mxu1  ;;  %v1266_v56 = vmul.f32 %v2986_v46, %v1047_v44  ;;  %v1298_v57 = vmul.f32 %v2986_v46, %v1127_v45  ;;  %v2271_v42 = vld [vmem:[%s2913_s11 + $0x68] sm:$0xff] }
  0xd6   : > { %2694 = vst [vmem:[%s3018_s27 + $0x190] sm:$0xff] %v2578_v43   ;;  %v1203_v52 = vmul.f32 %v2986_v46, %v889_v47  ;;  %v1235_v53 = vmul.f32 %v2986_v46, %v969_v49  ;;  %v2287_v43 = vld [vmem:[%s2913_s11 + $0xe8] sm:$0xff] }
  0xd7   : > { %v1398_v4 = vadd.f32 %v2996_v48, %v1266_v56  ;;  %v1430_v5 = vadd.f32 %v2996_v48, %v1298_v57 }
  0xd8   : > { %v1335_v54 = vadd.f32 %v2996_v48, %v1203_v52  ;;  %v1367_v55 = vadd.f32 %v2996_v48, %v1235_v53  ;;  %v2303_v52 = vld [vmem:[%s2913_s11 + $0x168] sm:$0xff] }
  0xd9   : > { %v1526_v14 = vmax.f32 %v1398_v4, 0.0  ;;  %v1558_v15 = vmax.f32 %v1430_v5, 0.0  ;;  %v2319_v53 = vld [vmem:[%s2913_s11 + $0x1e8] sm:$0xff] }
  0xda   : > { %v1463_v60 = vmax.f32 %v1335_v54, 0.0  ;;  %v1495_v61 = vmax.f32 %v1367_v55, 0.0 }
  0xdc   : > { %v2343_v62 = vpack.c.bf16 %v1463_v60, %v1462_v58  ;;  %v2423_v63 = vpack.c.bf16 %v1495_v61, %v1494_v59  ;;  %v1049_v0 = vpop.f32.mrf.mxu2  ;;  %v1129_v1 = vpop.f32.mrf.mxu3 }
  0xdd   : > { %v1267_v6 = vmul.f32 %v2986_v46, %v1049_v0  ;;  %v1299_v7 = vmul.f32 %v2986_v46, %v1129_v1  ;;  %v892_v8 = vpop.f32.mrf.mxu0  ;;  %v972_v9 = vpop.f32.mrf.mxu1 }
  0xde   : > { %2647 = vst [vmem:[%s3018_s27 + $0x18] sm:$0xff] %v2343_v62   ;;  %v1204_v18 = vmul.f32 %v2986_v46, %v892_v8  ;;  %v1236_v19 = vmul.f32 %v2986_v46, %v972_v9 }
  0xdf   : > { %2663 = vst [vmem:[%s3018_s27 + $0x98] sm:$0xff] %v2423_v63   ;;  %v1399_v12 = vadd.f32 %v2996_v48, %v1267_v6  ;;  %v1431_v13 = vadd.f32 %v2996_v48, %v1299_v7 }
  0xe0   : > { %2201 = vmatmul.msk.bf16.gmra.mxu0 %vm663_vm2, %v2270_v2  ;;  %2217 = vmatmul.msk.bf16.gmra.mxu1 %vm663_vm2, %v2286_v3  ;;  %v1336_v26 = vadd.f32 %v2996_v48, %v1204_v18  ;;  %v1368_v27 = vadd.f32 %v2996_v48, %v1236_v19 }
  0xe1   : > { %v1527_v16 = vmax.f32 %v1399_v12, 0.0  ;;  %v1559_v17 = vmax.f32 %v1431_v13, 0.0  ;;  %2233 = vmatmul.msk.bf16.gmra.mxu2 %vm663_vm2, %v2302_v10  ;;  %2249 = vmatmul.msk.bf16.gmra.mxu3 %vm663_vm2, %v2318_v11 }
  0xe2   : > { %v1464_v34 = vmax.f32 %v1336_v26, 0.0  ;;  %v1496_v35 = vmax.f32 %v1368_v27, 0.0 }
  0xe3   : > { %v2503_v20 = vpack.c.bf16 %v1527_v16, %v1526_v14  ;;  %v2583_v21 = vpack.c.bf16 %v1559_v17, %v1558_v15 }
  0xe4   : > { %v1052_v22 = vpop.f32.mrf.mxu2  ;;  %v1132_v23 = vpop.f32.mrf.mxu3 }
  0xe5   : > { %2679 = vst [vmem:[%s3018_s27 + $0x118] sm:$0xff] %v2503_v20   ;;  %v894_v24 = vpop.f32.mrf.mxu0  ;;  %v974_v25 = vpop.f32.mrf.mxu1  ;;  %v1268_v32 = vmul.f32 %v2986_v46, %v1052_v22  ;;  %v1300_v33 = vmul.f32 %v2986_v46, %v1132_v23  ;;  %v2272_v20 = vld [vmem:[%s2913_s11 + $0x70] sm:$0xff] }
  0xe6   : > { %2695 = vst [vmem:[%s3018_s27 + $0x198] sm:$0xff] %v2583_v21   ;;  %v1205_v28 = vmul.f32 %v2986_v46, %v894_v24  ;;  %v1237_v29 = vmul.f32 %v2986_v46, %v974_v25  ;;  %v2288_v21 = vld [vmem:[%s2913_s11 + $0xf0] sm:$0xff] }
  0xe7   : > { %v1400_v44 = vadd.f32 %v2996_v48, %v1268_v32  ;;  %v1432_v45 = vadd.f32 %v2996_v48, %v1300_v33 }
  0xe8   : > { %v1337_v30 = vadd.f32 %v2996_v48, %v1205_v28  ;;  %v1369_v31 = vadd.f32 %v2996_v48, %v1237_v29  ;;  %v2304_v28 = vld [vmem:[%s2913_s11 + $0x170] sm:$0xff] }
  0xe9   : > { %v1528_v56 = vmax.f32 %v1400_v44, 0.0  ;;  %v1560_v57 = vmax.f32 %v1432_v45, 0.0  ;;  %v2320_v29 = vld [vmem:[%s2913_s11 + $0x1f0] sm:$0xff] }
  0xea   : > { %v1465_v36 = vmax.f32 %v1337_v30, 0.0  ;;  %v1497_v37 = vmax.f32 %v1369_v31, 0.0 }
  0xec   : > { %v2348_v38 = vpack.c.bf16 %v1465_v36, %v1464_v34  ;;  %v2428_v39 = vpack.c.bf16 %v1497_v37, %v1496_v35  ;;  %v1054_v40 = vpop.f32.mrf.mxu2  ;;  %v1134_v41 = vpop.f32.mrf.mxu3 }
  0xed   : > { %v1269_v47 = vmul.f32 %v2986_v46, %v1054_v40  ;;  %v1301_v49 = vmul.f32 %v2986_v46, %v1134_v41  ;;  %v897_v50 = vpop.f32.mrf.mxu0  ;;  %v977_v51 = vpop.f32.mrf.mxu1 }
  0xee   : > { %2648 = vst [vmem:[%s3018_s27 + $0x20] sm:$0xff] %v2348_v38   ;;  %v1206_v60 = vmul.f32 %v2986_v46, %v897_v50  ;;  %v1238_v61 = vmul.f32 %v2986_v46, %v977_v51 }
  0xef   : > { %2664 = vst [vmem:[%s3018_s27 + $0xa0] sm:$0xff] %v2428_v39   ;;  %v1401_v54 = vadd.f32 %v2996_v48, %v1269_v47  ;;  %v1433_v55 = vadd.f32 %v2996_v48, %v1301_v49 }
  0xf0   : > { %2202 = vmatmul.msk.bf16.gmra.mxu0 %vm663_vm2, %v2271_v42  ;;  %2218 = vmatmul.msk.bf16.gmra.mxu1 %vm663_vm2, %v2287_v43  ;;  %v1338_v4 = vadd.f32 %v2996_v48, %v1206_v60  ;;  %v1370_v5 = vadd.f32 %v2996_v48, %v1238_v61 }
  0xf1   : > { %v1529_v58 = vmax.f32 %v1401_v54, 0.0  ;;  %v1561_v59 = vmax.f32 %v1433_v55, 0.0  ;;  %2234 = vmatmul.msk.bf16.gmra.mxu2 %vm663_vm2, %v2303_v52  ;;  %2250 = vmatmul.msk.bf16.gmra.mxu3 %vm663_vm2, %v2319_v53 }
  0xf2   : > { %v1466_v12 = vmax.f32 %v1338_v4, 0.0  ;;  %v1498_v13 = vmax.f32 %v1370_v5, 0.0 }
  0xf3   : > { %v2508_v62 = vpack.c.bf16 %v1529_v58, %v1528_v56  ;;  %v2588_v63 = vpack.c.bf16 %v1561_v59, %v1560_v57 }
  0xf4   : > { %v1057_v0 = vpop.f32.mrf.mxu2  ;;  %v1137_v1 = vpop.f32.mrf.mxu3 }
  0xf5   : > { %2680 = vst [vmem:[%s3018_s27 + $0x120] sm:$0xff] %v2508_v62   ;;  %v899_v2 = vpop.f32.mrf.mxu0  ;;  %v979_v3 = vpop.f32.mrf.mxu1  ;;  %v1270_v10 = vmul.f32 %v2986_v46, %v1057_v0  ;;  %v1302_v11 = vmul.f32 %v2986_v46, %v1137_v1  ;;  %v2273_v62 = vld [vmem:[%s2913_s11 + $0x78] sm:$0xff] }
  0xf6   : > { %2696 = vst [vmem:[%s3018_s27 + $0x1a0] sm:$0xff] %v2588_v63   ;;  %v1207_v6 = vmul.f32 %v2986_v46, %v899_v2  ;;  %v1239_v7 = vmul.f32 %v2986_v46, %v979_v3  ;;  %v2289_v63 = vld [vmem:[%s2913_s11 + $0xf8] sm:$0xff] }
  0xf7   : > { %v1402_v22 = vadd.f32 %v2996_v48, %v1270_v10  ;;  %v1434_v23 = vadd.f32 %v2996_v48, %v1302_v11 }
  0xf8   : > { %v1339_v8 = vadd.f32 %v2996_v48, %v1207_v6  ;;  %v1371_v9 = vadd.f32 %v2996_v48, %v1239_v7  ;;  %v2305_v6 = vld [vmem:[%s2913_s11 + $0x178] sm:$0xff] }
  0xf9   : > { %v1530_v32 = vmax.f32 %v1402_v22, 0.0  ;;  %v1562_v33 = vmax.f32 %v1434_v23, 0.0  ;;  %v2321_v7 = vld [vmem:[%s2913_s11 + $0x1f8] sm:$0xff]  ;;  %s1841_s11 = scalar_lea.sflag [#allocation3], %s189_s22 }
  0xfa   : > { %v1467_v14 = vmax.f32 %v1339_v8, 0.0  ;;  %v1499_v15 = vmax.f32 %v1371_v9, 0.0 }
  0xfc   : > { %v2353_v16 = vpack.c.bf16 %v1467_v14, %v1466_v12  ;;  %v2433_v17 = vpack.c.bf16 %v1499_v15, %v1498_v13  ;;  %v1059_v18 = vpop.f32.mrf.mxu2  ;;  %v1139_v19 = vpop.f32.mrf.mxu3 }
  0xfd   : > { %v1271_v24 = vmul.f32 %v2986_v46, %v1059_v18  ;;  %v1303_v25 = vmul.f32 %v2986_v46, %v1139_v19  ;;  %v902_v26 = vpop.f32.mrf.mxu0  ;;  %v982_v27 = vpop.f32.mrf.mxu1 }
  0xfe   : > { %2649 = vst [vmem:[%s3018_s27 + $0x28] sm:$0xff] %v2353_v16   ;;  %v1208_v36 = vmul.f32 %v2986_v46, %v902_v26  ;;  %v1240_v37 = vmul.f32 %v2986_v46, %v982_v27 }
  0xff   : > { %2665 = vst [vmem:[%s3018_s27 + $0xa8] sm:$0xff] %v2433_v17   ;;  %v1403_v30 = vadd.f32 %v2996_v48, %v1271_v24  ;;  %v1435_v31 = vadd.f32 %v2996_v48, %v1303_v25 }
 0x100   : > { %2203 = vmatmul.msk.bf16.gmra.mxu0 %vm663_vm2, %v2272_v20  ;;  %2219 = vmatmul.msk.bf16.gmra.mxu1 %vm663_vm2, %v2288_v21  ;;  %v1340_v44 = vadd.f32 %v2996_v48, %v1208_v36  ;;  %v1372_v45 = vadd.f32 %v2996_v48, %v1240_v37 }
 0x101   : > { %v1531_v34 = vmax.f32 %v1403_v30, 0.0  ;;  %v1563_v35 = vmax.f32 %v1435_v31, 0.0  ;;  %2235 = vmatmul.msk.bf16.gmra.mxu2 %vm663_vm2, %v2304_v28  ;;  %2251 = vmatmul.msk.bf16.gmra.mxu3 %vm663_vm2, %v2320_v29 }
 0x102   : > { %v1468_v54 = vmax.f32 %v1340_v44, 0.0  ;;  %v1500_v55 = vmax.f32 %v1372_v45, 0.0 }
 0x103   : > { %v2513_v38 = vpack.c.bf16 %v1531_v34, %v1530_v32  ;;  %v2593_v39 = vpack.c.bf16 %v1563_v35, %v1562_v33 }
 0x104   : > { %v1062_v40 = vpop.f32.mrf.mxu2  ;;  %v1142_v41 = vpop.f32.mrf.mxu3 }
 0x105   : > { %2681 = vst [vmem:[%s3018_s27 + $0x128] sm:$0xff] %v2513_v38   ;;  %v904_v42 = vpop.f32.mrf.mxu0  ;;  %v984_v43 = vpop.f32.mrf.mxu1  ;;  %v1272_v52 = vmul.f32 %v2986_v46, %v1062_v40  ;;  %v1304_v53 = vmul.f32 %v2986_v46, %v1142_v41 }
 0x106   : > { %2697 = vst [vmem:[%s3018_s27 + $0x1a8] sm:$0xff] %v2593_v39   ;;  %v1209_v47 = vmul.f32 %v2986_v46, %v904_v42  ;;  %v1241_v49 = vmul.f32 %v2986_v46, %v984_v43 }
 0x107   : > { %v1404_v0 = vadd.f32 %v2996_v48, %v1272_v52  ;;  %v1436_v1 = vadd.f32 %v2996_v48, %v1304_v53 }
 0x108   : > { %v1341_v50 = vadd.f32 %v2996_v48, %v1209_v47  ;;  %v1373_v51 = vadd.f32 %v2996_v48, %v1241_v49 }
 0x109   : > { %v1532_v10 = vmax.f32 %v1404_v0, 0.0  ;;  %v1564_v11 = vmax.f32 %v1436_v1, 0.0 }
 0x10a   : > { %v1469_v56 = vmax.f32 %v1341_v50, 0.0  ;;  %v1501_v57 = vmax.f32 %v1373_v51, 0.0 }
 0x10c   : > { %v2358_v58 = vpack.c.bf16 %v1469_v56, %v1468_v54  ;;  %v2438_v59 = vpack.c.bf16 %v1501_v57, %v1500_v55  ;;  %v1064_v60 = vpop.f32.mrf.mxu2  ;;  %v1144_v61 = vpop.f32.mrf.mxu3 }
 0x10d   : > { %v1273_v2 = vmul.f32 %v2986_v46, %v1064_v60  ;;  %v1305_v3 = vmul.f32 %v2986_v46, %v1144_v61  ;;  %v907_v4 = vpop.f32.mrf.mxu0  ;;  %v987_v5 = vpop.f32.mrf.mxu1 }
 0x10e   : > { %2650 = vst [vmem:[%s3018_s27 + $0x30] sm:$0xff] %v2358_v58   ;;  %v1210_v14 = vmul.f32 %v2986_v46, %v907_v4  ;;  %v1242_v15 = vmul.f32 %v2986_v46, %v987_v5 }
 0x10f   : > { %2666 = vst [vmem:[%s3018_s27 + $0xb0] sm:$0xff] %v2438_v59   ;;  %v1405_v8 = vadd.f32 %v2996_v48, %v1273_v2  ;;  %v1437_v9 = vadd.f32 %v2996_v48, %v1305_v3 }
 0x110   : > { %2204 = vmatmul.msk.bf16.gmra.mxu0 %vm663_vm2, %v2273_v62  ;;  %2220 = vmatmul.msk.bf16.gmra.mxu1 %vm663_vm2, %v2289_v63  ;;  %v1342_v22 = vadd.f32 %v2996_v48, %v1210_v14  ;;  %v1374_v23 = vadd.f32 %v2996_v48, %v1242_v15 }
 0x111   : > { %v1533_v12 = vmax.f32 %v1405_v8, 0.0  ;;  %v1565_v13 = vmax.f32 %v1437_v9, 0.0  ;;  %2236 = vmatmul.msk.bf16.gmra.mxu2 %vm663_vm2, %v2305_v6  ;;  %2252 = vmatmul.msk.bf16.gmra.mxu3 %vm663_vm2, %v2321_v7 }
 0x112   : > { %v1470_v30 = vmax.f32 %v1342_v22, 0.0  ;;  %v1502_v31 = vmax.f32 %v1374_v23, 0.0 }
 0x113   : > { %v2518_v16 = vpack.c.bf16 %v1533_v12, %v1532_v10  ;;  %v2598_v17 = vpack.c.bf16 %v1565_v13, %v1564_v11 }
 0x114   : > { %v1067_v18 = vpop.f32.mrf.mxu2  ;;  %v1147_v19 = vpop.f32.mrf.mxu3 }
 0x115   : > { %2682 = vst [vmem:[%s3018_s27 + $0x130] sm:$0xff] %v2518_v16   ;;  %v909_v20 = vpop.f32.mrf.mxu0  ;;  %v989_v21 = vpop.f32.mrf.mxu1  ;;  %v1274_v28 = vmul.f32 %v2986_v46, %v1067_v18  ;;  %v1306_v29 = vmul.f32 %v2986_v46, %v1147_v19 }
 0x116   : > { %2698 = vst [vmem:[%s3018_s27 + $0x1b0] sm:$0xff] %v2598_v17   ;;  %v1211_v24 = vmul.f32 %v2986_v46, %v909_v20  ;;  %v1243_v25 = vmul.f32 %v2986_v46, %v989_v21 }
 0x117   : > { %v1406_v38 = vadd.f32 %v2996_v48, %v1274_v28  ;;  %v1438_v39 = vadd.f32 %v2996_v48, %v1306_v29 }
 0x118   : > { %v1343_v26 = vadd.f32 %v2996_v48, %v1211_v24  ;;  %v1375_v27 = vadd.f32 %v2996_v48, %v1243_v25 }
 0x119   : > { %v1534_v47 = vmax.f32 %v1406_v38, 0.0  ;;  %v1566_v49 = vmax.f32 %v1438_v39, 0.0 }
 0x11a   : > { %v1471_v32 = vmax.f32 %v1343_v26, 0.0  ;;  %v1503_v33 = vmax.f32 %v1375_v27, 0.0 }
 0x11c   : > { %v2363_v34 = vpack.c.bf16 %v1471_v32, %v1470_v30  ;;  %v2443_v35 = vpack.c.bf16 %v1503_v33, %v1502_v31  ;;  %v1069_v36 = vpop.f32.mrf.mxu2  ;;  %v1149_v37 = vpop.f32.mrf.mxu3 }
 0x11d   : > { %v1275_v40 = vmul.f32 %v2986_v46, %v1069_v36  ;;  %v1307_v41 = vmul.f32 %v2986_v46, %v1149_v37  ;;  %v912_v42 = vpop.f32.mrf.mxu0  ;;  %v992_v43 = vpop.f32.mrf.mxu1 }
 0x11e   : > { %2651 = vst [vmem:[%s3018_s27 + $0x38] sm:$0xff] %v2363_v34   ;;  %v1212_v52 = vmul.f32 %v2986_v46, %v912_v42  ;;  %v1244_v53 = vmul.f32 %v2986_v46, %v992_v43 }
 0x11f   : > { %2667 = vst [vmem:[%s3018_s27 + $0xb8] sm:$0xff] %v2443_v35   ;;  %v1407_v44 = vadd.f32 %v2996_v48, %v1275_v40  ;;  %v1439_v45 = vadd.f32 %v2996_v48, %v1307_v41 }
 0x120   : > { %v1344_v60 = vadd.f32 %v2996_v48, %v1212_v52  ;;  %v1376_v61 = vadd.f32 %v2996_v48, %v1244_v53 }
 0x121   : > { %v1535_v50 = vmax.f32 %v1407_v44, 0.0  ;;  %v1567_v51 = vmax.f32 %v1439_v45, 0.0 }
 0x122   : > { %v1472_v4 = vmax.f32 %v1344_v60, 0.0  ;;  %v1504_v5 = vmax.f32 %v1376_v61, 0.0 }
 0x123   : > { %v2523_v54 = vpack.c.bf16 %v1535_v50, %v1534_v47  ;;  %v2603_v55 = vpack.c.bf16 %v1567_v51, %v1566_v49 }
 0x124   : > { %v1072_v56 = vpop.f32.mrf.mxu2  ;;  %v1152_v57 = vpop.f32.mrf.mxu3 }
 0x125   : > { %2683 = vst [vmem:[%s3018_s27 + $0x138] sm:$0xff] %v2523_v54   ;;  %v914_v58 = vpop.f32.mrf.mxu0  ;;  %v994_v59 = vpop.f32.mrf.mxu1  ;;  %v1276_v2 = vmul.f32 %v2986_v46, %v1072_v56  ;;  %v1308_v3 = vmul.f32 %v2986_v46, %v1152_v57 }
 0x126   : > { %2699 = vst [vmem:[%s3018_s27 + $0x1b8] sm:$0xff] %v2603_v55   ;;  %v1213_v62 = vmul.f32 %v2986_v46, %v914_v58  ;;  %v1245_v63 = vmul.f32 %v2986_v46, %v994_v59 }
 0x127   : > { %v1408_v12 = vadd.f32 %v2996_v48, %v1276_v2  ;;  %v1440_v13 = vadd.f32 %v2996_v48, %v1308_v3 }
 0x128   : > { %v1345_v0 = vadd.f32 %v2996_v48, %v1213_v62  ;;  %v1377_v1 = vadd.f32 %v2996_v48, %v1245_v63 }
 0x129   : > { %v1536_v20 = vmax.f32 %v1408_v12, 0.0  ;;  %v1568_v21 = vmax.f32 %v1440_v13, 0.0 }
 0x12a   : > { %v1473_v6 = vmax.f32 %v1345_v0, 0.0  ;;  %v1505_v7 = vmax.f32 %v1377_v1, 0.0 }
 0x12c   : > { %v2368_v8 = vpack.c.bf16 %v1473_v6, %v1472_v4  ;;  %v2448_v9 = vpack.c.bf16 %v1505_v7, %v1504_v5  ;;  %v1074_v10 = vpop.f32.mrf.mxu2  ;;  %v1154_v11 = vpop.f32.mrf.mxu3 }
 0x12d   : > { %v1277_v14 = vmul.f32 %v2986_v46, %v1074_v10  ;;  %v1309_v15 = vmul.f32 %v2986_v46, %v1154_v11  ;;  %v917_v16 = vpop.f32.mrf.mxu0  ;;  %v997_v17 = vpop.f32.mrf.mxu1 }
 0x12e   : > { %2652 = vst [vmem:[%s3018_s27 + $0x40] sm:$0xff] %v2368_v8   ;;  %v1214_v24 = vmul.f32 %v2986_v46, %v917_v16  ;;  %v1246_v25 = vmul.f32 %v2986_v46, %v997_v17 }
 0x12f   : > { %2668 = vst [vmem:[%s3018_s27 + $0xc0] sm:$0xff] %v2448_v9   ;;  %v1409_v18 = vadd.f32 %v2996_v48, %v1277_v14  ;;  %v1441_v19 = vadd.f32 %v2996_v48, %v1309_v15 }
 0x130   : > { %v1346_v32 = vadd.f32 %v2996_v48, %v1214_v24  ;;  %v1378_v33 = vadd.f32 %v2996_v48, %v1246_v25 }
 0x131   : > { %v1537_v22 = vmax.f32 %v1409_v18, 0.0  ;;  %v1569_v23 = vmax.f32 %v1441_v19, 0.0 }
 0x132   : > { %v1474_v40 = vmax.f32 %v1346_v32, 0.0  ;;  %v1506_v41 = vmax.f32 %v1378_v33, 0.0 }
 0x133   : > { %v2528_v26 = vpack.c.bf16 %v1537_v22, %v1536_v20  ;;  %v2608_v27 = vpack.c.bf16 %v1569_v23, %v1568_v21 }
 0x134   : > { %v1077_v28 = vpop.f32.mrf.mxu2  ;;  %v1157_v29 = vpop.f32.mrf.mxu3 }
 0x135   : > { %2684 = vst [vmem:[%s3018_s27 + $0x140] sm:$0xff] %v2528_v26   ;;  %v919_v30 = vpop.f32.mrf.mxu0  ;;  %v999_v31 = vpop.f32.mrf.mxu1  ;;  %v1278_v38 = vmul.f32 %v2986_v46, %v1077_v28  ;;  %v1310_v39 = vmul.f32 %v2986_v46, %v1157_v29 }
 0x136   : > { %2700 = vst [vmem:[%s3018_s27 + $0x1c0] sm:$0xff] %v2608_v27   ;;  %v1215_v34 = vmul.f32 %v2986_v46, %v919_v30  ;;  %v1247_v35 = vmul.f32 %v2986_v46, %v999_v31 }
 0x137   : > { %v1410_v50 = vadd.f32 %v2996_v48, %v1278_v38  ;;  %v1442_v51 = vadd.f32 %v2996_v48, %v1310_v39 }
 0x138   : > { %v1347_v36 = vadd.f32 %v2996_v48, %v1215_v34  ;;  %v1379_v37 = vadd.f32 %v2996_v48, %v1247_v35 }
 0x139   : > { %v1538_v58 = vmax.f32 %v1410_v50, 0.0  ;;  %v1570_v59 = vmax.f32 %v1442_v51, 0.0 }
 0x13a   : > { %v1475_v42 = vmax.f32 %v1347_v36, 0.0  ;;  %v1507_v43 = vmax.f32 %v1379_v37, 0.0 }
 0x13c   : > { %v2373_v44 = vpack.c.bf16 %v1475_v42, %v1474_v40  ;;  %v2453_v45 = vpack.c.bf16 %v1507_v43, %v1506_v41  ;;  %v1079_v47 = vpop.f32.mrf.mxu2  ;;  %v1159_v49 = vpop.f32.mrf.mxu3 }
 0x13d   : > { %v1279_v52 = vmul.f32 %v2986_v46, %v1079_v47  ;;  %v1311_v53 = vmul.f32 %v2986_v46, %v1159_v49  ;;  %v922_v54 = vpop.f32.mrf.mxu0  ;;  %v1002_v55 = vpop.f32.mrf.mxu1 }
 0x13e   : > { %2653 = vst [vmem:[%s3018_s27 + $0x48] sm:$0xff] %v2373_v44   ;;  %v1216_v62 = vmul.f32 %v2986_v46, %v922_v54  ;;  %v1248_v63 = vmul.f32 %v2986_v46, %v1002_v55  ;;  %v3285_v44 = vld [vmem:[%s3424_s2] ss:$0 sm:$0xff] }
 0x13f   : > { %2669 = vst [vmem:[%s3018_s27 + $0xc8] sm:$0xff] %v2453_v45   ;;  %v1411_v56 = vadd.f32 %v2996_v48, %v1279_v52  ;;  %v1443_v57 = vadd.f32 %v2996_v48, %v1311_v53 }
 0x140   : > { %v1348_v6 = vadd.f32 %v2996_v48, %v1216_v62  ;;  %v1380_v7 = vadd.f32 %v2996_v48, %v1248_v63 }
 0x141   : > { %v1539_v60 = vmax.f32 %v1411_v56, 0.0  ;;  %v1571_v61 = vmax.f32 %v1443_v57, 0.0 }
 0x142   : > { %v1476_v14 = vmax.f32 %v1348_v6, 0.0  ;;  %v1508_v15 = vmax.f32 %v1380_v7, 0.0 }
 0x143   : > { %v2533_v0 = vpack.c.bf16 %v1539_v60, %v1538_v58  ;;  %v2613_v1 = vpack.c.bf16 %v1571_v61, %v1570_v59  ;;  %v3296_v60 = vld [vmem:[%s3425_s3] ss:$0 sm:$0xff] }
 0x144   : > { %v1082_v2 = vpop.f32.mrf.mxu2  ;;  %v1162_v3 = vpop.f32.mrf.mxu3 }
 0x145   : > { %2685 = vst [vmem:[%s3018_s27 + $0x148] sm:$0xff] %v2533_v0   ;;  %v924_v4 = vpop.f32.mrf.mxu0  ;;  %v1004_v5 = vpop.f32.mrf.mxu1  ;;  %v1280_v12 = vmul.f32 %v2986_v46, %v1082_v2  ;;  %v1312_v13 = vmul.f32 %v2986_v46, %v1162_v3 }
 0x146   : > { %2701 = vst [vmem:[%s3018_s27 + $0x1c8] sm:$0xff] %v2613_v1   ;;  %v1217_v8 = vmul.f32 %v2986_v46, %v924_v4  ;;  %v1249_v9 = vmul.f32 %v2986_v46, %v1004_v5 }
 0x147   : > { %v1412_v22 = vadd.f32 %v2996_v48, %v1280_v12  ;;  %v1444_v23 = vadd.f32 %v2996_v48, %v1312_v13 }
 0x148   : > { %v1349_v10 = vadd.f32 %v2996_v48, %v1217_v8  ;;  %v1381_v11 = vadd.f32 %v2996_v48, %v1249_v9 }
 0x149   : > { %v1540_v30 = vmax.f32 %v1412_v22, 0.0  ;;  %v1572_v31 = vmax.f32 %v1444_v23, 0.0 }
 0x14a   : > { %v1477_v16 = vmax.f32 %v1349_v10, 0.0  ;;  %v1509_v17 = vmax.f32 %v1381_v11, 0.0 }
 0x14c   : > { %v2378_v18 = vpack.c.bf16 %v1477_v16, %v1476_v14  ;;  %v2458_v19 = vpack.c.bf16 %v1509_v17, %v1508_v15  ;;  %v1084_v20 = vpop.f32.mrf.mxu2  ;;  %v1164_v21 = vpop.f32.mrf.mxu3 }
 0x14d   : > { %v1281_v24 = vmul.f32 %v2986_v46, %v1084_v20  ;;  %v1313_v25 = vmul.f32 %v2986_v46, %v1164_v21  ;;  %v927_v26 = vpop.f32.mrf.mxu0  ;;  %v1007_v27 = vpop.f32.mrf.mxu1 }
 0x14e   : > { %2654 = vst [vmem:[%s3018_s27 + $0x50] sm:$0xff] %v2378_v18   ;;  %v1218_v34 = vmul.f32 %v2986_v46, %v927_v26  ;;  %v1250_v35 = vmul.f32 %v2986_v46, %v1007_v27 }
 0x14f   : > { %2670 = vst [vmem:[%s3018_s27 + $0xd0] sm:$0xff] %v2458_v19   ;;  %v1413_v28 = vadd.f32 %v2996_v48, %v1281_v24  ;;  %v1445_v29 = vadd.f32 %v2996_v48, %v1313_v25 }
 0x150   : > { %v1350_v42 = vadd.f32 %v2996_v48, %v1218_v34  ;;  %v1382_v43 = vadd.f32 %v2996_v48, %v1250_v35 }
 0x151   : > { %v1541_v32 = vmax.f32 %v1413_v28, 0.0  ;;  %v1573_v33 = vmax.f32 %v1445_v29, 0.0 }
 0x152   : > { %v1478_v52 = vmax.f32 %v1350_v42, 0.0  ;;  %v1510_v53 = vmax.f32 %v1382_v43, 0.0 }
 0x153   : > { %v2538_v36 = vpack.c.bf16 %v1541_v32, %v1540_v30  ;;  %v2618_v37 = vpack.c.bf16 %v1573_v33, %v1572_v31 }
 0x154   : > { %v1087_v38 = vpop.f32.mrf.mxu2  ;;  %v1167_v39 = vpop.f32.mrf.mxu3 }
 0x155   : > { %2686 = vst [vmem:[%s3018_s27 + $0x150] sm:$0xff] %v2538_v36   ;;  %v929_v40 = vpop.f32.mrf.mxu0  ;;  %v1009_v41 = vpop.f32.mrf.mxu1  ;;  %v1282_v50 = vmul.f32 %v3285_v44, %v1087_v38  ;;  %v1314_v51 = vmul.f32 %v3285_v44, %v1167_v39 }
 0x156   : > { %2702 = vst [vmem:[%s3018_s27 + $0x1d0] sm:$0xff] %v2618_v37   ;;  %v1219_v45 = vmul.f32 %v3285_v44, %v929_v40  ;;  %v1251_v46 = vmul.f32 %v3285_v44, %v1009_v41 }
 0x157   : > { %v1446_v61 = vadd.f32 %v3296_v60, %v1314_v51 }
 0x158   : > { %v1351_v47 = vadd.f32 %v2996_v48, %v1219_v45  ;;  %v1383_v49 = vadd.f32 %v2996_v48, %v1251_v46  ;;  %v1414_v48 = vadd.f32 %v3296_v60, %v1282_v50 }
 0x159   : > { %v1574_v5 = vmax.f32 %v1446_v61, 0.0 }
 0x15a   : > { %v1479_v54 = vmax.f32 %v1351_v47, 0.0  ;;  %v1511_v55 = vmax.f32 %v1383_v49, 0.0  ;;  %v1542_v4 = vmax.f32 %v1414_v48, 0.0 }
 0x15c   : > { %v2383_v56 = vpack.c.bf16 %v1479_v54, %v1478_v52  ;;  %v2463_v57 = vpack.c.bf16 %v1511_v55, %v1510_v53  ;;  %v1089_v58 = vpop.f32.mrf.mxu2  ;;  %v1169_v59 = vpop.f32.mrf.mxu3 }
 0x15d   : > { %v1283_v62 = vmul.f32 %v3285_v44, %v1089_v58  ;;  %v1315_v63 = vmul.f32 %v3285_v44, %v1169_v59  ;;  %v932_v0 = vpop.f32.mrf.mxu0  ;;  %v1012_v1 = vpop.f32.mrf.mxu1 }
 0x15e   : > { %2655 = vst [vmem:[%s3018_s27 + $0x58] sm:$0xff] %v2383_v56   ;;  %v1220_v8 = vmul.f32 %v3285_v44, %v932_v0  ;;  %v1252_v9 = vmul.f32 %v3285_v44, %v1012_v1 }
 0x15f   : > { %2671 = vst [vmem:[%s3018_s27 + $0xd8] sm:$0xff] %v2463_v57   ;;  %v1415_v2 = vadd.f32 %v3296_v60, %v1283_v62  ;;  %v1447_v3 = vadd.f32 %v3296_v60, %v1315_v63 }
 0x160   : > { %v1352_v16 = vadd.f32 %v3296_v60, %v1220_v8  ;;  %v1384_v17 = vadd.f32 %v3296_v60, %v1252_v9 }
 0x161   : > { %v1543_v6 = vmax.f32 %v1415_v2, 0.0  ;;  %v1575_v7 = vmax.f32 %v1447_v3, 0.0 }
 0x162   : > { %v1480_v24 = vmax.f32 %v1352_v16, 0.0  ;;  %v1512_v25 = vmax.f32 %v1384_v17, 0.0 }
 0x163   : > { %v2543_v10 = vpack.c.bf16 %v1543_v6, %v1542_v4  ;;  %v2623_v11 = vpack.c.bf16 %v1575_v7, %v1574_v5 }
 0x164   : > { %v1092_v12 = vpop.f32.mrf.mxu2  ;;  %v1172_v13 = vpop.f32.mrf.mxu3 }
 0x165   : > { %2687 = vst [vmem:[%s3018_s27 + $0x158] sm:$0xff] %v2543_v10   ;;  %v934_v14 = vpop.f32.mrf.mxu0  ;;  %v1014_v15 = vpop.f32.mrf.mxu1  ;;  %v1284_v22 = vmul.f32 %v3285_v44, %v1092_v12  ;;  %v1316_v23 = vmul.f32 %v3285_v44, %v1172_v13 }
 0x166   : > { %2703 = vst [vmem:[%s3018_s27 + $0x1d8] sm:$0xff] %v2623_v11   ;;  %v1221_v18 = vmul.f32 %v3285_v44, %v934_v14  ;;  %v1253_v19 = vmul.f32 %v3285_v44, %v1014_v15 }
 0x167   : > { %v1416_v32 = vadd.f32 %v3296_v60, %v1284_v22  ;;  %v1448_v33 = vadd.f32 %v3296_v60, %v1316_v23 }
 0x168   : > { %v1353_v20 = vadd.f32 %v3296_v60, %v1221_v18  ;;  %v1385_v21 = vadd.f32 %v3296_v60, %v1253_v19 }
 0x169   : > { %v1544_v40 = vmax.f32 %v1416_v32, 0.0  ;;  %v1576_v41 = vmax.f32 %v1448_v33, 0.0 }
 0x16a   : > { %v1481_v26 = vmax.f32 %v1353_v20, 0.0  ;;  %v1513_v27 = vmax.f32 %v1385_v21, 0.0 }
 0x16c   : > { %v2388_v28 = vpack.c.bf16 %v1481_v26, %v1480_v24  ;;  %v2468_v29 = vpack.c.bf16 %v1513_v27, %v1512_v25  ;;  %v1094_v30 = vpop.f32.mrf.mxu2  ;;  %v1174_v31 = vpop.f32.mrf.mxu3 }
 0x16d   : > { %v1285_v34 = vmul.f32 %v3285_v44, %v1094_v30  ;;  %v1317_v35 = vmul.f32 %v3285_v44, %v1174_v31  ;;  %v937_v36 = vpop.f32.mrf.mxu0  ;;  %v1017_v37 = vpop.f32.mrf.mxu1 }
 0x16e   : > { %2656 = vst [vmem:[%s3018_s27 + $0x60] sm:$0xff] %v2388_v28   ;;  %v1222_v45 = vmul.f32 %v3285_v44, %v937_v36  ;;  %v1254_v46 = vmul.f32 %v3285_v44, %v1017_v37 }
 0x16f   : > { %2672 = vst [vmem:[%s3018_s27 + $0xe0] sm:$0xff] %v2468_v29   ;;  %v1417_v38 = vadd.f32 %v3296_v60, %v1285_v34  ;;  %v1449_v39 = vadd.f32 %v3296_v60, %v1317_v35 }
 0x170   : > { %v1354_v54 = vadd.f32 %v3296_v60, %v1222_v45  ;;  %v1386_v55 = vadd.f32 %v3296_v60, %v1254_v46 }
 0x171   : > { %v1545_v42 = vmax.f32 %v1417_v38, 0.0  ;;  %v1577_v43 = vmax.f32 %v1449_v39, 0.0 }
 0x172   : > { %v1482_v62 = vmax.f32 %v1354_v54, 0.0  ;;  %v1514_v63 = vmax.f32 %v1386_v55, 0.0 }
 0x173   : > { %v2548_v47 = vpack.c.bf16 %v1545_v42, %v1544_v40  ;;  %v2628_v49 = vpack.c.bf16 %v1577_v43, %v1576_v41 }
 0x174   : > { %v1097_v50 = vpop.f32.mrf.mxu2  ;;  %v1177_v51 = vpop.f32.mrf.mxu3 }
 0x175   : > { %2688 = vst [vmem:[%s3018_s27 + $0x160] sm:$0xff] %v2548_v47   ;;  %v939_v52 = vpop.f32.mrf.mxu0  ;;  %v1019_v53 = vpop.f32.mrf.mxu1  ;;  %v1286_v48 = vmul.f32 %v3285_v44, %v1097_v50  ;;  %v1318_v61 = vmul.f32 %v3285_v44, %v1177_v51 }
 0x176   : > { %2704 = vst [vmem:[%s3018_s27 + $0x1e0] sm:$0xff] %v2628_v49   ;;  %v1223_v56 = vmul.f32 %v3285_v44, %v939_v52  ;;  %v1255_v57 = vmul.f32 %v3285_v44, %v1019_v53 }
 0x177   : > { %v1418_v6 = vadd.f32 %v3296_v60, %v1286_v48  ;;  %v1450_v7 = vadd.f32 %v3296_v60, %v1318_v61 }
 0x178   : > { %v1355_v58 = vadd.f32 %v3296_v60, %v1223_v56  ;;  %v1387_v59 = vadd.f32 %v3296_v60, %v1255_v57 }
 0x179   : > { %v1546_v14 = vmax.f32 %v1418_v6, 0.0  ;;  %v1578_v15 = vmax.f32 %v1450_v7, 0.0 }
 0x17a   : > { %v1483_v0 = vmax.f32 %v1355_v58, 0.0  ;;  %v1515_v1 = vmax.f32 %v1387_v59, 0.0 }
 0x17c   : > { %v2393_v2 = vpack.c.bf16 %v1483_v0, %v1482_v62  ;;  %v2473_v3 = vpack.c.bf16 %v1515_v1, %v1514_v63  ;;  %v1099_v4 = vpop.f32.mrf.mxu2  ;;  %v1179_v5 = vpop.f32.mrf.mxu3 }
 0x17d   : > { %v1287_v8 = vmul.f32 %v3285_v44, %v1099_v4  ;;  %v1319_v9 = vmul.f32 %v3285_v44, %v1179_v5  ;;  %v942_v10 = vpop.f32.mrf.mxu0  ;;  %v1022_v11 = vpop.f32.mrf.mxu1 }
 0x17e   : > { %2657 = vst [vmem:[%s3018_s27 + $0x68] sm:$0xff] %v2393_v2   ;;  %v1224_v18 = vmul.f32 %v3285_v44, %v942_v10  ;;  %v1256_v19 = vmul.f32 %v3285_v44, %v1022_v11 }
 0x17f   : > { %2673 = vst [vmem:[%s3018_s27 + $0xe8] sm:$0xff] %v2473_v3   ;;  %v1419_v12 = vadd.f32 %v3296_v60, %v1287_v8  ;;  %v1451_v13 = vadd.f32 %v3296_v60, %v1319_v9 }
 0x180   : > { %v1356_v26 = vadd.f32 %v3296_v60, %v1224_v18  ;;  %v1388_v27 = vadd.f32 %v3296_v60, %v1256_v19 }
 0x181   : > { %v1547_v16 = vmax.f32 %v1419_v12, 0.0  ;;  %v1579_v17 = vmax.f32 %v1451_v13, 0.0 }
 0x182   : > { %v1484_v34 = vmax.f32 %v1356_v26, 0.0  ;;  %v1516_v35 = vmax.f32 %v1388_v27, 0.0 }
 0x183   : > { %v2553_v20 = vpack.c.bf16 %v1547_v16, %v1546_v14  ;;  %v2633_v21 = vpack.c.bf16 %v1579_v17, %v1578_v15 }
 0x184   : > { %v1102_v22 = vpop.f32.mrf.mxu2  ;;  %v1182_v23 = vpop.f32.mrf.mxu3 }
 0x185   : > { %2689 = vst [vmem:[%s3018_s27 + $0x168] sm:$0xff] %v2553_v20   ;;  %v944_v24 = vpop.f32.mrf.mxu0  ;;  %v1024_v25 = vpop.f32.mrf.mxu1  ;;  %v1288_v32 = vmul.f32 %v3285_v44, %v1102_v22  ;;  %v1320_v33 = vmul.f32 %v3285_v44, %v1182_v23 }
 0x186   : > { %2705 = vst [vmem:[%s3018_s27 + $0x1e8] sm:$0xff] %v2633_v21   ;;  %v1225_v28 = vmul.f32 %v3285_v44, %v944_v24  ;;  %v1257_v29 = vmul.f32 %v3285_v44, %v1024_v25 }
 0x187   : > { %v1420_v42 = vadd.f32 %v3296_v60, %v1288_v32  ;;  %v1452_v43 = vadd.f32 %v3296_v60, %v1320_v33 }
 0x188   : > { %v1357_v30 = vadd.f32 %v3296_v60, %v1225_v28  ;;  %v1389_v31 = vadd.f32 %v3296_v60, %v1257_v29 }
 0x189   : > { %v1548_v52 = vmax.f32 %v1420_v42, 0.0  ;;  %v1580_v53 = vmax.f32 %v1452_v43, 0.0 }
 0x18a   : > { %v1485_v36 = vmax.f32 %v1357_v30, 0.0  ;;  %v1517_v37 = vmax.f32 %v1389_v31, 0.0 }
 0x18c   : > { %v2398_v38 = vpack.c.bf16 %v1485_v36, %v1484_v34  ;;  %v2478_v39 = vpack.c.bf16 %v1517_v37, %v1516_v35  ;;  %v1104_v40 = vpop.f32.mrf.mxu2  ;;  %v1184_v41 = vpop.f32.mrf.mxu3 }
 0x18d   : > { %v1289_v45 = vmul.f32 %v3285_v44, %v1104_v40  ;;  %v1321_v46 = vmul.f32 %v3285_v44, %v1184_v41  ;;  %v947_v47 = vpop.f32.mrf.mxu0  ;;  %v1027_v49 = vpop.f32.mrf.mxu1 }
 0x18e   : > { %2658 = vst [vmem:[%s3018_s27 + $0x70] sm:$0xff] %v2398_v38   ;;  %v1226_v56 = vmul.f32 %v3285_v44, %v947_v47  ;;  %v1258_v57 = vmul.f32 %v3285_v44, %v1027_v49 }
 0x18f   : > { %2674 = vst [vmem:[%s3018_s27 + $0xf0] sm:$0xff] %v2478_v39   ;;  %v1421_v50 = vadd.f32 %v3296_v60, %v1289_v45  ;;  %v1453_v51 = vadd.f32 %v3296_v60, %v1321_v46 }
 0x190   : > { %v1358_v0 = vadd.f32 %v3296_v60, %v1226_v56  ;;  %v1390_v1 = vadd.f32 %v3296_v60, %v1258_v57 }
 0x191   : > { %v1549_v54 = vmax.f32 %v1421_v50, 0.0  ;;  %v1581_v55 = vmax.f32 %v1453_v51, 0.0 }
 0x192   : > { %v1486_v8 = vmax.f32 %v1358_v0, 0.0  ;;  %v1518_v9 = vmax.f32 %v1390_v1, 0.0 }
 0x193   : > { %v2558_v58 = vpack.c.bf16 %v1549_v54, %v1548_v52  ;;  %v2638_v59 = vpack.c.bf16 %v1581_v55, %v1580_v53 }
 0x194   : > { %v1107_v48 = vpop.f32.mrf.mxu2  ;;  %v1187_v61 = vpop.f32.mrf.mxu3 }
 0x195   : > { %2690 = vst [vmem:[%s3018_s27 + $0x170] sm:$0xff] %v2558_v58   ;;  %v949_v62 = vpop.f32.mrf.mxu0  ;;  %v1029_v63 = vpop.f32.mrf.mxu1  ;;  %v1290_v6 = vmul.f32 %v3285_v44, %v1107_v48  ;;  %v1322_v7 = vmul.f32 %v3285_v44, %v1187_v61 }
 0x196   : > { %2706 = vst [vmem:[%s3018_s27 + $0x1f0] sm:$0xff] %v2638_v59   ;;  %v1227_v2 = vmul.f32 %v3285_v44, %v949_v62  ;;  %v1259_v3 = vmul.f32 %v3285_v44, %v1029_v63 }
 0x197   : > { %v1422_v16 = vadd.f32 %v3296_v60, %v1290_v6  ;;  %v1454_v17 = vadd.f32 %v3296_v60, %v1322_v7 }
 0x198   : > { %v1359_v4 = vadd.f32 %v3296_v60, %v1227_v2  ;;  %v1391_v5 = vadd.f32 %v3296_v60, %v1259_v3 }
 0x199   : > { %v1550_v22 = vmax.f32 %v1422_v16, 0.0  ;;  %v1582_v23 = vmax.f32 %v1454_v17, 0.0 }
 0x19a   : > { %v1487_v10 = vmax.f32 %v1359_v4, 0.0  ;;  %v1519_v11 = vmax.f32 %v1391_v5, 0.0 }
 0x19c   : > { %v2403_v12 = vpack.c.bf16 %v1487_v10, %v1486_v8  ;;  %v2483_v13 = vpack.c.bf16 %v1519_v11, %v1518_v9  ;;  %v1109_v14 = vpop.f32.mrf.mxu2  ;;  %v1189_v15 = vpop.f32.mrf.mxu3 }
 0x19d   : > { %v1291_v18 = vmul.f32 %v3285_v44, %v1109_v14  ;;  %v1323_v19 = vmul.f32 %v3285_v44, %v1189_v15 }
 0x19e   : > { %2659 = vst [vmem:[%s3018_s27 + $0x78] sm:$0xff] %v2403_v12  }
 0x19f   : > { %2675 = vst [vmem:[%s3018_s27 + $0xf8] sm:$0xff] %v2483_v13   ;;  %v1423_v20 = vadd.f32 %v3296_v60, %v1291_v18  ;;  %v1455_v21 = vadd.f32 %v3296_v60, %v1323_v19 }
 0x1a1   : > { %v1551_v24 = vmax.f32 %v1423_v20, 0.0  ;;  %v1583_v44 = vmax.f32 %v1455_v21, 0.0 }
 0x1a3   : > { %v2563_v25 = vpack.c.bf16 %v1551_v24, %v1550_v22  ;;  %v2643_v26 = vpack.c.bf16 %v1583_v44, %v1582_v23 }
 0x1a5   : > { %2691 = vst [vmem:[%s3018_s27 + $0x178] sm:$0xff] %v2563_v25  }
 0x1a6   : > { %2707 = vst [vmem:[%s3018_s27 + $0x1f8] sm:$0xff] %v2643_v26  }
 0x1a7   : > { %2787 = shalt.err (!%p2784_p3)
}
 0x1a8   : > { %s2825_s22 = smov 64   ;;  %s2826_s27 = smov 4  }
 0x1a9   : > { %2714 = dma.vmem_to_hbm [thread:$0]  (%p2890_p5), %s1854_s19, 8192, %s1856_s10, %s1841_s11, %s2825_s22, %s2825_s22, %s2826_s27  }
 0x1aa PF: > { %p2720_p4 = scmp.ge.s32.totalorder %s2822_s18, 2  ;;  %s1870_s30 = sand.u32 1, %s2810_s15  }
 0x1ab   : > { %s1871_s5 = scalar_lea.sflag [#allocation3], %s1870_s30 }
 0x1ac   : > { %p2717_p7 = pnand %p2720_p4, %p2894_p6 }
 0x1ae   : > { %p2718_p8 = pneg %p2717_p7 }
 0x1b0   : > { %2805 = dma.done.wait (%p2718_p8), %s1871_s5, 8192  }
 0x1b1   : > { %2807 = vsyncadd (%p2718_p8), %s1871_s5, 4294959104  ;;  %p14_p9 = scmp.ge.s32.totalorder %s2877_s21, 4   ;;  %s3429_s15 = smov %s2814_s16 }
 0x1b2   : > { %s3430_s16 = smov %s2818_s17  ;;  %s3431_s17 = smov %s2888_s24 }
 0x1b3   : > { %s3432_s18 = smov %s2877_s21  ;;  %16 = sbr.rel (!%p14_p9) target bundleno = 3 (0x3), region = 71 }
 0x1b8   :  { %1877 = vsyncpa [#allocation3], 1 }
 0x1b9   :  { %1879 = vsyncpa [#allocation3 + $0x1], 1 }

</bundles_post_ra>
